<compile_context>
chip_gen: v7x
topology: tpu7x:2x2x1
jax: 0.10.0
libtpu: 0.0.40
codegen_flags: <defaults>
</compile_context>

<pallas_src>
import functools

import jax
import jax.numpy as jnp
from jax.experimental import pallas as pl
from jax.experimental.pallas import tpu as pltpu


def mlp_kernel(x_ref, w1_ref, b1_ref, w2_ref, b2_ref,
               w3_ref, b3_ref, w4_ref, b4_ref, o_ref, *, dim_out):
    # x may arrive as f32 (no-pad path) or bf16 (padded path); cast is cheap
    # and hides under the layer-1 matmul.
    x = x_ref[...].astype(jnp.bfloat16)

    # layer_input: (TB, din_pad) @ (din_pad, 512) + (1, 512) -> ReLU
    h = jnp.dot(x, w1_ref[...], preferred_element_type=jnp.float32)
    h = jnp.maximum(h + b1_ref[...], 0.0)
    # dropout(p=0) is the identity -> omitted.

    # layer_hidden1: (TB, 512) @ (512, 256) + (1, 256) -> ReLU
    h = jnp.dot(h.astype(jnp.bfloat16), w2_ref[...],
                preferred_element_type=jnp.float32)
    h = jnp.maximum(h + b2_ref[...], 0.0)

    # layer_hidden2: (TB, 256) @ (256, 64) + (1, 64) -> ReLU
    h = jnp.dot(h.astype(jnp.bfloat16), w3_ref[...],
                preferred_element_type=jnp.float32)
    h = jnp.maximum(h + b3_ref[...], 0.0)

    # layer_out: (TB, 64) @ (64, dout_pad) + (1, dout_pad)
    logits = jnp.dot(h.astype(jnp.bfloat16), w4_ref[...],
                     preferred_element_type=jnp.float32)
    logits = logits + b4_ref[...]

    # Mask the zero-padded output columns so they vanish from the softmax.
    n_pad = logits.shape[-1]
    if dim_out < n_pad:
        col = jax.lax.broadcasted_iota(jnp.int32, logits.shape, 1)
        logits = jnp.where(col < dim_out, logits, jnp.float32(-1e30))

    # softmax over dim=1 (feature axis), numerically stable, exact divide.
    m = jnp.max(logits, axis=-1, keepdims=True)
    e = jnp.exp(logits - m)
    s = jnp.sum(e, axis=-1, keepdims=True)
    o_ref[...] = (e / s).astype(o_ref.dtype)


def _round_up(n, m):
    return ((n + m - 1) // m) * m


def _choose_tb(B, tb_max=1024):
    """Pick the batch tile: >=2 grid steps when B allows (v7x 2-TC sharding),
    rows rounded to 16 (bf16 sublane pack) or 128 (MXU M dim)."""
    if B <= 16:
        return 16
    half = (B + 1) // 2
    if half <= 128:
        tb = _round_up(half, 16)
    else:
        tb = _round_up(half, 128)
    return min(tb, tb_max)


def mlp_forward(x_nchw, params, *, tb_max=1024):
    """x_nchw: (B, C, H, W) float32.  params: dict of transposed weights/biases."""
    B = x_nchw.shape[0]
    dim_in = x_nchw.shape[1] * x_nchw.shape[-2] * x_nchw.shape[-1]
    dim_out = params["w4"].shape[1]

    LANE = 128
    din_pad = _round_up(dim_in, LANE)    # lane-dense layer-1 K dim
    dout_pad = _round_up(dim_out, LANE)  # lane-dense output (kills vst.msk)

    tb = _choose_tb(B, tb_max)
    b_pad = pl.cdiv(B, tb) * tb

    # Flatten exactly like x.view(-1, C*H*W).
    x2d = x_nchw.reshape(B, dim_in)
    need_pad = (b_pad != B) or (din_pad != dim_in)
    if need_pad:
        # Fused cast + pad in one wrapper pass; padded rows/cols are zero and
        # padded rows are sliced off before returning.
        x2d = jnp.pad(x2d.astype(jnp.bfloat16),
                      ((0, b_pad - B), (0, din_pad - dim_in)))
    # else: pass f32 and cast to bf16 inside the kernel (saves an HBM pass).

    # bf16 weights (halves the dominant weight-DMA bytes, bf16 MXU fast path);
    # biases stay f32 for the element-wise f32 path.
    w1 = params["w1"].astype(jnp.bfloat16)
    if din_pad != dim_in:
        w1 = jnp.pad(w1, ((0, din_pad - dim_in), (0, 0)))
    w2 = params["w2"].astype(jnp.bfloat16)
    w3 = params["w3"].astype(jnp.bfloat16)
    w4 = params["w4"].astype(jnp.bfloat16)
    b1 = params["b1"].astype(jnp.float32)
    b2 = params["b2"].astype(jnp.float32)
    b3 = params["b3"].astype(jnp.float32)
    b4 = params["b4"].astype(jnp.float32)
    if dout_pad != dim_out:
        w4 = jnp.pad(w4, ((0, 0), (0, dout_pad - dim_out)))
        b4 = jnp.pad(b4, ((0, 0), (0, dout_pad - dim_out)))

    # Weights/biases: constant block index -> VMEM-resident across grid steps.
    # TODO(synk): for very large dim_in on v7x, single-buffer these
    # (pipeline_mode=pl.Buffered(1)) to avoid double-buffering resident weights.
    resident = lambda shape: pl.BlockSpec(shape, lambda i: (0,) * len(shape))

    out = pl.pallas_call(
        functools.partial(mlp_kernel, dim_out=dim_out),
        out_shape=jax.ShapeDtypeStruct((b_pad, dout_pad), jnp.float32),
        grid=(b_pad // tb,),
        in_specs=[
            pl.BlockSpec((tb, din_pad), lambda i: (i, 0)),
            resident(w1.shape), resident(b1.shape),
            resident(w2.shape), resident(b2.shape),
            resident(w3.shape), resident(b3.shape),
            resident(w4.shape), resident(b4.shape),
        ],
        out_specs=pl.BlockSpec((tb, dout_pad), lambda i: (i, 0)),
        compiler_params=pltpu.CompilerParams(
            dimension_semantics=("parallel",),   # shard batch across TCs (v7x)
            vmem_limit_bytes=32 << 20,           # ~11 MiB worst case; headroom
        ),
    )(x2d, w1, b1, w2, b2, w3, b3, w4, b4)

    return out[:B, :dim_out]


def mlp_reference(x_nchw, params):
    """Pure-JAX reference mirroring the kernel's bf16-weight / f32-accumulate math."""
    B = x_nchw.shape[0]
    dim_in = x_nchw.shape[1] * x_nchw.shape[-2] * x_nchw.shape[-1]
    h = x_nchw.reshape(B, dim_in).astype(jnp.bfloat16)
    logits = None
    for i in range(1, 5):
        w = params[f"w{i}"].astype(jnp.bfloat16)
        b = params[f"b{i}"].astype(jnp.float32)
        z = jnp.dot(h, w, preferred_element_type=jnp.float32) + b
        if i < 4:
            h = jnp.maximum(z, 0.0).astype(jnp.bfloat16)
        else:
            logits = z
    return jax.nn.softmax(logits, axis=-1)


def init_params(key, dim_in, dim_out):
    """Deterministic init mimicking nn.Linear (uniform(-1/sqrt(fan_in), +...)).
    Weights are stored pre-transposed as (in_features, out_features)."""
    dims = [(dim_in, 512), (512, 256), (256, 64), (64, dim_out)]
    params = {}
    for i, (fan_in, fan_out) in enumerate(dims, start=1):
        key, kw, kb = jax.random.split(key, 3)
        bound = 1.0 / jnp.sqrt(jnp.float32(fan_in))
        params[f"w{i}"] = jax.random.uniform(
            kw, (fan_in, fan_out), jnp.float32, minval=-bound, maxval=bound)
        params[f"b{i}"] = jax.random.uniform(
            kb, (1, fan_out), jnp.float32, minval=-bound, maxval=bound)
    return params


if __name__ == "__main__":
    key = jax.random.PRNGKey(0)
    kx, kp = jax.random.split(key)

    # Small NCHW input: batch=2, channels=4, spatial=16 -> dim_in = 1024
    B, C, H, W = 2, 4, 16, 16
    dim_in = C * H * W
    dim_out = 10

    x = jax.random.normal(kx, (B, C, H, W), dtype=jnp.float32)
    params = init_params(kp, dim_in, dim_out)

    out = mlp_forward(x, params)
    out = jax.block_until_ready(out)

    # sanity: shape, softmax rows sum to 1, and agreement with pure-JAX ref
    assert out.shape == (B, dim_out)
    row_sums = jnp.sum(out, axis=1)
    assert bool(jnp.all(jnp.abs(row_sums - 1.0) < 1e-4))
    ref = mlp_reference(x, params)
    assert bool(jnp.max(jnp.abs(out - ref)) < 2e-2)

    print("KERNEL_OK")
</pallas_src>

<mosaic_0001>
module attributes {stable_mosaic.version = 11 : i64} {
  func.func @mlp_kernel(%arg0: i32, %arg1: memref<16x1024xbf16, #tpu.memory_space<vmem>>, %arg2: memref<1024x512xbf16, #tpu.memory_space<vmem>>, %arg3: memref<1x512xf32, #tpu.memory_space<vmem>>, %arg4: memref<512x256xbf16, #tpu.memory_space<vmem>>, %arg5: memref<1x256xf32, #tpu.memory_space<vmem>>, %arg6: memref<256x64xbf16, #tpu.memory_space<vmem>>, %arg7: memref<1x64xf32, #tpu.memory_space<vmem>>, %arg8: memref<64x128xbf16, #tpu.memory_space<vmem>>, %arg9: memref<1x128xf32, #tpu.memory_space<vmem>>, %arg10: memref<16x128xf32, #tpu.memory_space<vmem>>) attributes {dimension_semantics = [#tpu.dimension_semantics<parallel>], iteration_bounds = array<i64: 1>, scalar_prefetch = 0 : i64, scratch_operands = 0 : i64, tpu.core_type = #tpu.core_type<tc>, window_params = [{transform_indices = @transform_0, window_bounds = array<i64: 16, 1024>}, {pipeline_mode = #tpu.pipeline_mode<synchronous>, transform_indices = @transform_1, window_bounds = array<i64: 1024, 512>}, {pipeline_mode = #tpu.pipeline_mode<synchronous>, transform_indices = @transform_2, window_bounds = array<i64: 1, 512>}, {pipeline_mode = #tpu.pipeline_mode<synchronous>, transform_indices = @transform_3, window_bounds = array<i64: 512, 256>}, {pipeline_mode = #tpu.pipeline_mode<synchronous>, transform_indices = @transform_4, window_bounds = array<i64: 1, 256>}, {pipeline_mode = #tpu.pipeline_mode<synchronous>, transform_indices = @transform_5, window_bounds = array<i64: 256, 64>}, {pipeline_mode = #tpu.pipeline_mode<synchronous>, transform_indices = @transform_6, window_bounds = array<i64: 1, 64>}, {pipeline_mode = #tpu.pipeline_mode<synchronous>, transform_indices = @transform_7, window_bounds = array<i64: 64, 128>}, {pipeline_mode = #tpu.pipeline_mode<synchronous>, transform_indices = @transform_8, window_bounds = array<i64: 1, 128>}, {transform_indices = @transform_9, window_bounds = array<i64: 16, 128>}]} {
    %c0 = arith.constant 0 : index
    %c0_0 = arith.constant 0 : index
    %0 = vector.load %arg1[%c0, %c0_0] : memref<16x1024xbf16, #tpu.memory_space<vmem>>, vector<16x1024xbf16>
    %c0_1 = arith.constant 0 : index
    %c0_2 = arith.constant 0 : index
    %1 = vector.load %arg2[%c0_1, %c0_2] : memref<1024x512xbf16, #tpu.memory_space<vmem>>, vector<1024x512xbf16>
    %cst = arith.constant dense<0.000000e+00> : vector<16x512xf32>
    %2 = tpu.matmul %0, %1, %cst {dimension_numbers = #tpu.dot_dimension_numbers<[1], [0], [0], [1], [0, 0, 1, 1], [], []>} : vector<16x1024xbf16>, vector<1024x512xbf16>, vector<16x512xf32> -> vector<16x512xf32>
    %c0_3 = arith.constant 0 : index
    %c0_4 = arith.constant 0 : index
    %3 = vector.load %arg3[%c0_3, %c0_4] : memref<1x512xf32, #tpu.memory_space<vmem>>, vector<1x512xf32>
    %4 = vector.broadcast %3 : vector<1x512xf32> to vector<16x512xf32>
    %5 = arith.addf %2, %4 : vector<16x512xf32>
    %cst_5 = arith.constant 0.000000e+00 : f32
    %6 = vector.broadcast %cst_5 : f32 to vector<16x512xf32>
    %7 = arith.maximumf %5, %6 : vector<16x512xf32>
    %8 = arith.truncf %7 : vector<16x512xf32> to vector<16x512xbf16>
    %c0_6 = arith.constant 0 : index
    %c0_7 = arith.constant 0 : index
    %9 = vector.load %arg4[%c0_6, %c0_7] : memref<512x256xbf16, #tpu.memory_space<vmem>>, vector<512x256xbf16>
    %cst_8 = arith.constant dense<0.000000e+00> : vector<16x256xf32>
    %10 = tpu.matmul %8, %9, %cst_8 {dimension_numbers = #tpu.dot_dimension_numbers<[1], [0], [0], [1], [0, 0, 1, 1], [], []>} : vector<16x512xbf16>, vector<512x256xbf16>, vector<16x256xf32> -> vector<16x256xf32>
    %c0_9 = arith.constant 0 : index
    %c0_10 = arith.constant 0 : index
    %11 = vector.load %arg5[%c0_9, %c0_10] : memref<1x256xf32, #tpu.memory_space<vmem>>, vector<1x256xf32>
    %12 = vector.broadcast %11 : vector<1x256xf32> to vector<16x256xf32>
    %13 = arith.addf %10, %12 : vector<16x256xf32>
    %cst_11 = arith.constant 0.000000e+00 : f32
    %14 = vector.broadcast %cst_11 : f32 to vector<16x256xf32>
    %15 = arith.maximumf %13, %14 : vector<16x256xf32>
    %16 = arith.truncf %15 : vector<16x256xf32> to vector<16x256xbf16>
    %c0_12 = arith.constant 0 : index
    %c0_13 = arith.constant 0 : index
    %17 = vector.load %arg6[%c0_12, %c0_13] : memref<256x64xbf16, #tpu.memory_space<vmem>>, vector<256x64xbf16>
    %cst_14 = arith.constant dense<0.000000e+00> : vector<16x64xf32>
    %18 = tpu.matmul %16, %17, %cst_14 {dimension_numbers = #tpu.dot_dimension_numbers<[1], [0], [0], [1], [0, 0, 1, 1], [], []>} : vector<16x256xbf16>, vector<256x64xbf16>, vector<16x64xf32> -> vector<16x64xf32>
    %c0_15 = arith.constant 0 : index
    %c0_16 = arith.constant 0 : index
    %19 = vector.load %arg7[%c0_15, %c0_16] : memref<1x64xf32, #tpu.memory_space<vmem>>, vector<1x64xf32>
    %20 = vector.broadcast %19 : vector<1x64xf32> to vector<16x64xf32>
    %21 = arith.addf %18, %20 : vector<16x64xf32>
    %cst_17 = arith.constant 0.000000e+00 : f32
    %22 = vector.broadcast %cst_17 : f32 to vector<16x64xf32>
    %23 = arith.maximumf %21, %22 : vector<16x64xf32>
    %24 = arith.truncf %23 : vector<16x64xf32> to vector<16x64xbf16>
    %c0_18 = arith.constant 0 : index
    %c0_19 = arith.constant 0 : index
    %25 = vector.load %arg8[%c0_18, %c0_19] : memref<64x128xbf16, #tpu.memory_space<vmem>>, vector<64x128xbf16>
    %cst_20 = arith.constant dense<0.000000e+00> : vector<16x128xf32>
    %26 = tpu.matmul %24, %25, %cst_20 {dimension_numbers = #tpu.dot_dimension_numbers<[1], [0], [0], [1], [0, 0, 1, 1], [], []>} : vector<16x64xbf16>, vector<64x128xbf16>, vector<16x128xf32> -> vector<16x128xf32>
    %c0_21 = arith.constant 0 : index
    %c0_22 = arith.constant 0 : index
    %27 = vector.load %arg9[%c0_21, %c0_22] : memref<1x128xf32, #tpu.memory_space<vmem>>, vector<1x128xf32>
    %28 = vector.broadcast %27 : vector<1x128xf32> to vector<16x128xf32>
    %29 = arith.addf %26, %28 : vector<16x128xf32>
    %30 = tpu.iota {dimensions = array<i32: 1>} : vector<16x128xi32>
    %c10_i32 = arith.constant 10 : i32
    %31 = vector.broadcast %c10_i32 : i32 to vector<16x128xi32>
    %32 = arith.cmpi slt, %30, %31 : vector<16x128xi32>
    %cst_23 = arith.constant -1.000000e+30 : f32
    %33 = vector.broadcast %cst_23 : f32 to vector<16x128xf32>
    %34 = arith.select %32, %29, %33 : vector<16x128xi1>, vector<16x128xf32>
    %cst_24 = arith.constant dense<0xFF800000> : vector<16xf32>
    %35 = vector.multi_reduction <maximumf>, %34, %cst_24 [1] : vector<16x128xf32> to vector<16xf32>
    %36 = vector.shape_cast %35 : vector<16xf32> to vector<16x1xf32>
    %37 = vector.broadcast %36 : vector<16x1xf32> to vector<16x128xf32>
    %38 = arith.subf %34, %37 : vector<16x128xf32>
    %39 = math.exp %38 : vector<16x128xf32>
    %cst_25 = arith.constant dense<0.000000e+00> : vector<16xf32>
    %40 = vector.multi_reduction <add>, %39, %cst_25 [1] : vector<16x128xf32> to vector<16xf32>
    %41 = vector.shape_cast %40 : vector<16xf32> to vector<16x1xf32>
    %42 = vector.broadcast %41 : vector<16x1xf32> to vector<16x128xf32>
    %43 = arith.divf %39, %42 : vector<16x128xf32>
    %c0_26 = arith.constant 0 : index
    %c0_27 = arith.constant 0 : index
    %44 = vector.load %arg10[%c0_26, %c0_27] : memref<16x128xf32, #tpu.memory_space<vmem>>, vector<16x128xf32>
    tpu.vector_store %arg10[%c0_26, %c0_27], %43 {strides = array<i32>} : memref<16x128xf32, #tpu.memory_space<vmem>>, vector<16x128xf32>,
    return
  }
  func.func @transform_0(%arg0: i32) -> (i32, i32) {
    %c0_i32 = arith.constant 0 : i32
    %c0_i32_0 = arith.constant 0 : i32
    return %arg0, %c0_i32 : i32, i32
  }
  func.func @transform_1(%arg0: i32) -> (i32, i32) {
    %c0_i32 = arith.constant 0 : i32
    %c0_i32_0 = arith.constant 0 : i32
    %c0_i32_1 = arith.constant 0 : i32
    return %c0_i32, %c0_i32_0 : i32, i32
  }
  func.func @transform_2(%arg0: i32) -> (i32, i32) {
    %c0_i32 = arith.constant 0 : i32
    %c0_i32_0 = arith.constant 0 : i32
    %c0_i32_1 = arith.constant 0 : i32
    return %c0_i32, %c0_i32_0 : i32, i32
  }
  func.func @transform_3(%arg0: i32) -> (i32, i32) {
    %c0_i32 = arith.constant 0 : i32
    %c0_i32_0 = arith.constant 0 : i32
    %c0_i32_1 = arith.constant 0 : i32
    return %c0_i32, %c0_i32_0 : i32, i32
  }
  func.func @transform_4(%arg0: i32) -> (i32, i32) {
    %c0_i32 = arith.constant 0 : i32
    %c0_i32_0 = arith.constant 0 : i32
    %c0_i32_1 = arith.constant 0 : i32
    return %c0_i32, %c0_i32_0 : i32, i32
  }
  func.func @transform_5(%arg0: i32) -> (i32, i32) {
    %c0_i32 = arith.constant 0 : i32
    %c0_i32_0 = arith.constant 0 : i32
    %c0_i32_1 = arith.constant 0 : i32
    return %c0_i32, %c0_i32_0 : i32, i32
  }
  func.func @transform_6(%arg0: i32) -> (i32, i32) {
    %c0_i32 = arith.constant 0 : i32
    %c0_i32_0 = arith.constant 0 : i32
    %c0_i32_1 = arith.constant 0 : i32
    return %c0_i32, %c0_i32_0 : i32, i32
  }
  func.func @transform_7(%arg0: i32) -> (i32, i32) {
    %c0_i32 = arith.constant 0 : i32
    %c0_i32_0 = arith.constant 0 : i32
    %c0_i32_1 = arith.constant 0 : i32
    return %c0_i32, %c0_i32_0 : i32, i32
  }
  func.func @transform_8(%arg0: i32) -> (i32, i32) {
    %c0_i32 = arith.constant 0 : i32
    %c0_i32_0 = arith.constant 0 : i32
    %c0_i32_1 = arith.constant 0 : i32
    return %c0_i32, %c0_i32_0 : i32, i32
  }
  func.func @transform_9(%arg0: i32) -> (i32, i32) {
    %c0_i32 = arith.constant 0 : i32
    %c0_i32_0 = arith.constant 0 : i32
    return %arg0, %c0_i32 : i32, i32
  }
}

</mosaic_0001>

<bundles_post_ra>
// kernel: tpu_custom_call.1
= control target key start
LH: loop header
LB: loop body
LE: loop exit
PB: predicated region body
PF: predicated region fallthrough
CT: control target
= control target key end

     0   :  { %14 = vsyncpa [#allocation3], 0  ;;  %s4100_s0 = inlined_call_operand.vmem [shape: bf16[16,1024], index: 0, kind: input, shape index: {}]   ;;  %s4101_s1 = inlined_call_operand.hbm [shape: bf16[1024,512], index: 1, kind: input, shape index: {}]   ;;  %s4102_s2 = inlined_call_operand.vmem [shape: f32[1,512], index: 2, kind: input, shape index: {}]   ;;  %s4103_s3 = inlined_call_operand.hbm [shape: bf16[512,256], index: 3, kind: input, shape index: {}]   ;;  %s4104_s4 = inlined_call_operand.vmem [shape: f32[1,256], index: 4, kind: input, shape index: {}]   ;;  %s4105_s5 = inlined_call_operand.vmem [shape: bf16[256,64], index: 5, kind: input, shape index: {}]   ;;  %s4106_s6 = inlined_call_operand.vmem [shape: f32[1,64], index: 6, kind: input, shape index: {}]   ;;  %s4107_s7 = inlined_call_operand.vmem [shape: bf16[64,128], index: 7, kind: input, shape index: {}]   ;;  %s4108_s8 = inlined_call_operand.vmem [shape: f32[1,128], index: 8, kind: input, shape index: {}]   ;;  %s4109_s9 = inlined_call_operand.hbm [shape: f32[16,128], index: 9, kind: output, shape index: {}]  }
   0x1   :  { %15 = vsyncpa [#allocation6], 0 }
   0x2   :  { %16 = vsyncpa [#allocation4], 0  ;;  %s3837_s30 = smov [#allocation2]   ;;  %s3765_s13 = scalar_lea.hbm %s4101_s1, 32768 }
   0x3   :  { %s24_s10 = sshll.u32 %s3837_s30, 4  ;;  %p3766_p0 = scmp.ne.s32.totalorder %s4101_s1, %s3765_s13  ;;  %s25_s10 = int_to_ptr.vmem [resolvable:$true] %s24_s10 }
   0x4   :  { %p3769_p1 = scmp.lt.u32.totalorder %s3765_s13, %s4101_s1 }
   0x6   :  { %p3771_p2 = pnand %p3769_p1, %p3766_p0 }
   0x8   :  { %3774 = shalt.err (!%p3771_p2)
}
   0x9   :  { %s3775_s18 = scalar_lea.vmem %s25_s10, 32768  ;;  %p3780_p4 = scmp.lt.s32.totalorder %s25_s10, %s25_s10 }
   0xa   :  { %p3776_p3 = scmp.ne.s32.totalorder %s25_s10, %s3775_s18  ;;  %p3781_p5 = scmp.lt.s32.totalorder %s3775_s18, %s3775_s18 }
   0xc   :  { %p3782_p6 = por %p3781_p5, %p3780_p4 }
   0xe   :  { %p3783_p7 = pnand %p3782_p6, %p3776_p3 }
  0x10   :  { %3786 = shalt.err (!%p3783_p7)
}
  0x11   :  { %s3838_s19 = smov 256   ;;  %s3839_s20 = smov 16  }
  0x12   :  { %30 = dma.hbm_to_vmem [thread:$0]  %s4101_s1, 32768, %s25_s10, [#allocation3], %s3838_s19, %s3838_s19, %s3839_s20  }
  0x13   :  { %s3840_s23 = smov [#allocation5]   ;;  %s3787_s27 = scalar_lea.hbm %s4103_s3, 8192 }
  0x14   :  { %s38_s24 = sshll.u32 %s3840_s23, 4  ;;  %p3788_p8 = scmp.ne.s32.totalorder %s4103_s3, %s3787_s27  ;;  %s39_s24 = int_to_ptr.vmem [resolvable:$true] %s38_s24 }
  0x15   :  { %p3791_p9 = scmp.lt.u32.totalorder %s3787_s27, %s4103_s3 }
  0x17   :  { %p3793_p10 = pnand %p3791_p9, %p3788_p8 }
  0x19   :  { %3796 = shalt.err (!%p3793_p10)
}
  0x1a   :  { %s3797_s12 = scalar_lea.vmem %s39_s24, 8192  ;;  %p3802_p12 = scmp.lt.s32.totalorder %s39_s24, %s39_s24 }
  0x1b   :  { %p3798_p11 = scmp.ne.s32.totalorder %s39_s24, %s3797_s12  ;;  %p3803_p13 = scmp.lt.s32.totalorder %s3797_s12, %s3797_s12 }
  0x1d   :  { %p3804_p0 = por %p3803_p13, %p3802_p12 }
  0x1f   :  { %p3805_p1 = pnand %p3804_p0, %p3798_p11 }
  0x21   :  { %3808 = shalt.err (!%p3805_p1)
}
  0x22   :  { %s3841_s1 = smov 128   ;;  %s3842_s10 = smov 8  }
  0x23   :  { %44 = dma.hbm_to_vmem [thread:$0]  %s4103_s3, 8192, %s39_s24, [#allocation6], %s3841_s1, %s3841_s1, %s3842_s10  }
  0x24   :  { %3831 = dma.done.wait [#allocation3], 32768  }
  0x25   :  { %3832 = vsyncadd [#allocation3], 4294934528 }
  0x26   :  { %3833 = dma.done.wait [#allocation6], 8192  }
  0x27   :  { %3834 = vsyncadd [#allocation6], 4294959104  ;;  %v3257_v0 = vld [vmem:[#allocation2 + $0x4] ss:$16 sps:$4 sm:$0xff]   ;;  %v3261_v2 = vld [vmem:[#allocation2] ss:$16 sps:$4 sm:$0xff]  }
  0x28   :  { %v3259_v1 = vld [vmem:[#allocation2 + $0x204] ss:$16 sps:$4 sm:$0xff]   ;;  %1668 = vmatprep.subr.bf16.mxu1 %v3257_v0  ;;  %v3262_v3 = vld [vmem:[#allocation2 + $0x200] ss:$16 sps:$4 sm:$0xff]   ;;  %v63_v50 = vld [vmem:[%s4100_s0 + $0x8] sm:$0xff]  ;;  %vm3844_vm0 = vmmov 0  }
  0x29   :  { %1711 = vmatprep.subr.bf16.mxu0 %v3259_v1  ;;  %v3263_v4 = vld [vmem:[#allocation2 + $0x24] ss:$16 sps:$4 sm:$0xff]   ;;  %1669 = vmatpush1.bf16.msra.mxu1 %v3261_v2  ;;  %v3267_v6 = vld [vmem:[#allocation2 + $0x20] ss:$16 sps:$4 sm:$0xff]   ;;  %v67_v51 = vld [vmem:[%s4100_s0 + $0x28] sm:$0xff]  ;;  %vm2730_vm1 = vcmask 523264  }
  0x2a   :  { %1712 = vmatpush1.bf16.msra.mxu0 %v3262_v3  ;;  %v3265_v5 = vld [vmem:[#allocation2 + $0x224] ss:$16 sps:$4 sm:$0xff]   ;;  %1670 = vmatprep.subr.bf16.mxu1 %v3263_v4  ;;  %v3268_v7 = vld [vmem:[#allocation2 + $0x220] ss:$16 sps:$4 sm:$0xff]   ;;  %v3935_v55 = vcombine.high %v63_v50, %v67_v51 }
  0x2b   :  { %1713 = vmatprep.subr.bf16.mxu0 %v3265_v5  ;;  %v3269_v8 = vld [vmem:[#allocation2 + $0x44] ss:$16 sps:$4 sm:$0xff]   ;;  %v3273_v10 = vld [vmem:[#allocation2 + $0x40] ss:$16 sps:$4 sm:$0xff]  }
  0x2c   :  { %v3271_v9 = vld [vmem:[#allocation2 + $0x244] ss:$16 sps:$4 sm:$0xff]   ;;  %v3274_v11 = vld [vmem:[#allocation2 + $0x240] ss:$16 sps:$4 sm:$0xff]   ;;  %1743 = vmatprep.mubr.bf16.mxu0 %v3935_v55 }
  0x2d   :  { %1671 = vmatpush1.bf16.msra.mxu1 %v3267_v6  ;;  %v3275_v12 = vld [vmem:[#allocation2 + $0x64] ss:$16 sps:$4 sm:$0xff]   ;;  %v3279_v14 = vld [vmem:[#allocation2 + $0x60] ss:$16 sps:$4 sm:$0xff]  }
  0x2e   :  { %1714 = vmatpush1.bf16.msra.mxu0 %v3268_v7  ;;  %1672 = vmatprep.subr.bf16.mxu1 %v3269_v8  ;;  %v3277_v13 = vld [vmem:[#allocation2 + $0x264] ss:$16 sps:$4 sm:$0xff]   ;;  %v3280_v15 = vld [vmem:[#allocation2 + $0x260] ss:$16 sps:$4 sm:$0xff]   ;;  %v3358_v7 = vld [vmem:[#allocation2 + $0xc] ss:$16 sps:$4 sm:$0xff]  }
  0x2f   :  { %1715 = vmatprep.subr.bf16.mxu0 %v3271_v9  ;;  %v3281_v16 = vld [vmem:[#allocation2 + $0x84] ss:$16 sps:$4 sm:$0xff]   ;;  %v3285_v18 = vld [vmem:[#allocation2 + $0x80] ss:$16 sps:$4 sm:$0xff]   ;;  %v3940_v9 = vcombine.low %v63_v50, %v67_v51  ;;  %v3410_v50 = vld [vmem:[#allocation2 + $0x128] ss:$16 sps:$4 sm:$0xff]  }
  0x30   :  { %v3283_v17 = vld [vmem:[#allocation2 + $0x284] ss:$16 sps:$4 sm:$0xff]   ;;  %v3286_v19 = vld [vmem:[#allocation2 + $0x280] ss:$16 sps:$4 sm:$0xff]  }
  0x31   :  { %1673 = vmatpush1.bf16.msra.mxu1 %v3273_v10  ;;  %v3287_v20 = vld [vmem:[#allocation2 + $0xa4] ss:$16 sps:$4 sm:$0xff]   ;;  %v3291_v22 = vld [vmem:[#allocation2 + $0xa0] ss:$16 sps:$4 sm:$0xff]  }
  0x32   :  { %1716 = vmatpush1.bf16.msra.mxu0 %v3274_v11  ;;  %1674 = vmatprep.subr.bf16.mxu1 %v3275_v12  ;;  %v3289_v21 = vld [vmem:[#allocation2 + $0x2a4] ss:$16 sps:$4 sm:$0xff]   ;;  %v3292_v23 = vld [vmem:[#allocation2 + $0x2a0] ss:$16 sps:$4 sm:$0xff]   ;;  %v3356_v11 = vld [vmem:[#allocation2 + $0x8] ss:$16 sps:$4 sm:$0xff]  }
  0x33   :  { %1717 = vmatprep.subr.bf16.mxu0 %v3277_v13  ;;  %v3293_v24 = vld [vmem:[#allocation2 + $0xc4] ss:$16 sps:$4 sm:$0xff]   ;;  %v3297_v26 = vld [vmem:[#allocation2 + $0xc0] ss:$16 sps:$4 sm:$0xff]   ;;  %v3364_v13 = vld [vmem:[#allocation2 + $0x2c] ss:$16 sps:$4 sm:$0xff]  }
  0x34   :  { %v3295_v25 = vld [vmem:[#allocation2 + $0x2c4] ss:$16 sps:$4 sm:$0xff]   ;;  %v3298_v27 = vld [vmem:[#allocation2 + $0x2c0] ss:$16 sps:$4 sm:$0xff]  }
  0x35   :  { %1675 = vmatpush1.bf16.msra.mxu1 %v3279_v14  ;;  %v3299_v28 = vld [vmem:[#allocation2 + $0xe4] ss:$16 sps:$4 sm:$0xff]   ;;  %v3303_v30 = vld [vmem:[#allocation2 + $0xe0] ss:$16 sps:$4 sm:$0xff]  }
  0x36   :  { %1718 = vmatpush1.bf16.msra.mxu0 %v3280_v15  ;;  %1676 = vmatprep.subr.bf16.mxu1 %v3281_v16  ;;  %v3301_v29 = vld [vmem:[#allocation2 + $0x2e4] ss:$16 sps:$4 sm:$0xff]   ;;  %v3304_v31 = vld [vmem:[#allocation2 + $0x2e0] ss:$16 sps:$4 sm:$0xff]   ;;  %v3362_v15 = vld [vmem:[#allocation2 + $0x28] ss:$16 sps:$4 sm:$0xff]  }
  0x37   :  { %1719 = vmatprep.subr.bf16.mxu0 %v3283_v17  ;;  %v3305_v32 = vld [vmem:[#allocation2 + $0x104] ss:$16 sps:$4 sm:$0xff]   ;;  %v3309_v34 = vld [vmem:[#allocation2 + $0x100] ss:$16 sps:$4 sm:$0xff]   ;;  %v3370_v17 = vld [vmem:[#allocation2 + $0x4c] ss:$16 sps:$4 sm:$0xff]  }
  0x38   :  { %v3307_v33 = vld [vmem:[#allocation2 + $0x304] ss:$16 sps:$4 sm:$0xff]   ;;  %v3310_v35 = vld [vmem:[#allocation2 + $0x300] ss:$16 sps:$4 sm:$0xff]  }
  0x39   :  { %1677 = vmatpush1.bf16.msra.mxu1 %v3285_v18  ;;  %v3311_v36 = vld [vmem:[#allocation2 + $0x124] ss:$16 sps:$4 sm:$0xff]   ;;  %v3315_v38 = vld [vmem:[#allocation2 + $0x120] ss:$16 sps:$4 sm:$0xff]  }
  0x3a   :  { %1720 = vmatpush1.bf16.msra.mxu0 %v3286_v19  ;;  %1678 = vmatprep.subr.bf16.mxu1 %v3287_v20  ;;  %v3313_v37 = vld [vmem:[#allocation2 + $0x324] ss:$16 sps:$4 sm:$0xff]   ;;  %v3316_v39 = vld [vmem:[#allocation2 + $0x320] ss:$16 sps:$4 sm:$0xff]   ;;  %v3368_v19 = vld [vmem:[#allocation2 + $0x48] ss:$16 sps:$4 sm:$0xff]  }
  0x3b   :  { %1721 = vmatprep.subr.bf16.mxu0 %v3289_v21  ;;  %v3317_v40 = vld [vmem:[#allocation2 + $0x144] ss:$16 sps:$4 sm:$0xff]   ;;  %v3321_v42 = vld [vmem:[#allocation2 + $0x140] ss:$16 sps:$4 sm:$0xff]   ;;  %v3376_v21 = vld [vmem:[#allocation2 + $0x6c] ss:$16 sps:$4 sm:$0xff]  }
  0x3c   :  { %v3319_v41 = vld [vmem:[#allocation2 + $0x344] ss:$16 sps:$4 sm:$0xff]   ;;  %v3322_v43 = vld [vmem:[#allocation2 + $0x340] ss:$16 sps:$4 sm:$0xff]  }
  0x3d   :  { %1679 = vmatpush1.bf16.msra.mxu1 %v3291_v22  ;;  %v3323_v44 = vld [vmem:[#allocation2 + $0x164] ss:$16 sps:$4 sm:$0xff]   ;;  %v3327_v46 = vld [vmem:[#allocation2 + $0x160] ss:$16 sps:$4 sm:$0xff]  }
  0x3e   :  { %1722 = vmatpush1.bf16.msra.mxu0 %v3292_v23  ;;  %1680 = vmatprep.subr.bf16.mxu1 %v3293_v24  ;;  %v3325_v45 = vld [vmem:[#allocation2 + $0x364] ss:$16 sps:$4 sm:$0xff]   ;;  %v3328_v47 = vld [vmem:[#allocation2 + $0x360] ss:$16 sps:$4 sm:$0xff]   ;;  %v3374_v23 = vld [vmem:[#allocation2 + $0x68] ss:$16 sps:$4 sm:$0xff]  }
  0x3f   :  { %1723 = vmatprep.subr.bf16.mxu0 %v3295_v25  ;;  %v62_v48 = vld [vmem:[%s4100_s0] sm:$0xff]  ;;  %v3382_v25 = vld [vmem:[#allocation2 + $0x8c] ss:$16 sps:$4 sm:$0xff]  }
  0x40   :  { %v66_v49 = vld [vmem:[%s4100_s0 + $0x20] sm:$0xff] }
  0x41   :  { %1681 = vmatpush1.bf16.msra.mxu1 %v3297_v26  ;;  %v3329_v52 = vld [vmem:[#allocation2 + $0x184] ss:$16 sps:$4 sm:$0xff]   ;;  %v2819_v53 = vcombine.high %v62_v48, %v66_v49  ;;  %v3333_v56 = vld [vmem:[#allocation2 + $0x180] ss:$16 sps:$4 sm:$0xff]   ;;  %v3938_v8 = vcombine.low %v62_v48, %v66_v49  ;;  %v3412_v48 = vld [vmem:[#allocation2 + $0x12c] ss:$16 sps:$4 sm:$0xff]  }
  0x42   :  { %1724 = vmatpush1.bf16.msra.mxu0 %v3298_v27  ;;  %1682 = vmatprep.subr.bf16.mxu1 %v3299_v28  ;;  %v3331_v54 = vld [vmem:[#allocation2 + $0x384] ss:$16 sps:$4 sm:$0xff]   ;;  %v3334_v57 = vld [vmem:[#allocation2 + $0x380] ss:$16 sps:$4 sm:$0xff]   ;;  %v3380_v27 = vld [vmem:[#allocation2 + $0x88] ss:$16 sps:$4 sm:$0xff]  }
  0x43   :  { %1725 = vmatprep.subr.bf16.mxu0 %v3301_v29  ;;  %1700 = vmatprep.mubr.bf16.mxu1 %v2819_v53  ;;  %v3335_v58 = vld [vmem:[#allocation2 + $0x1a4] ss:$16 sps:$4 sm:$0xff]   ;;  %v3339_v60 = vld [vmem:[#allocation2 + $0x1a0] ss:$16 sps:$4 sm:$0xff]   ;;  %v3388_v29 = vld [vmem:[#allocation2 + $0xac] ss:$16 sps:$4 sm:$0xff]  }
  0x44   :  { %v3337_v59 = vld [vmem:[#allocation2 + $0x3a4] ss:$16 sps:$4 sm:$0xff]   ;;  %v3340_v61 = vld [vmem:[#allocation2 + $0x3a0] ss:$16 sps:$4 sm:$0xff]  }
  0x45   :  { %1683 = vmatpush1.bf16.msra.mxu1 %v3303_v30  ;;  %v3341_v62 = vld [vmem:[#allocation2 + $0x1c4] ss:$16 sps:$4 sm:$0xff]   ;;  %v3345_v0 = vld [vmem:[#allocation2 + $0x1c0] ss:$16 sps:$4 sm:$0xff]  }
  0x46   :  { %1726 = vmatpush1.bf16.msra.mxu0 %v3304_v31  ;;  %1684 = vmatprep.subr.bf16.mxu1 %v3305_v32  ;;  %v3343_v63 = vld [vmem:[#allocation2 + $0x3c4] ss:$16 sps:$4 sm:$0xff]   ;;  %v3346_v1 = vld [vmem:[#allocation2 + $0x3c0] ss:$16 sps:$4 sm:$0xff]   ;;  %v3386_v31 = vld [vmem:[#allocation2 + $0xa8] ss:$16 sps:$4 sm:$0xff]  }
  0x47   :  { %1727 = vmatprep.subr.bf16.mxu0 %v3307_v33  ;;  %v3347_v2 = vld [vmem:[#allocation2 + $0x1e4] ss:$16 sps:$4 sm:$0xff]   ;;  %v3351_v4 = vld [vmem:[#allocation2 + $0x1e0] ss:$16 sps:$4 sm:$0xff]   ;;  %v3394_v33 = vld [vmem:[#allocation2 + $0xcc] ss:$16 sps:$4 sm:$0xff]  }
  0x48   :  { %v3349_v3 = vld [vmem:[#allocation2 + $0x3e4] ss:$16 sps:$4 sm:$0xff]   ;;  %v3352_v5 = vld [vmem:[#allocation2 + $0x3e0] ss:$16 sps:$4 sm:$0xff]  }
  0x49   :  { %1685 = vmatpush1.bf16.msra.mxu1 %v3309_v34  ;;  %v3355_v6 = vld [vmem:[#allocation2 + $0x404] ss:$16 sps:$4 sm:$0xff]   ;;  %v3353_v10 = vld [vmem:[#allocation2 + $0x400] ss:$16 sps:$4 sm:$0xff]  }
  0x4a   :  { %1728 = vmatpush1.bf16.msra.mxu0 %v3310_v35  ;;  %1686 = vmatprep.subr.bf16.mxu1 %v3311_v36  ;;  %v3361_v12 = vld [vmem:[#allocation2 + $0x424] ss:$16 sps:$4 sm:$0xff]   ;;  %v3359_v14 = vld [vmem:[#allocation2 + $0x420] ss:$16 sps:$4 sm:$0xff]  }
  0x4b   :  { %1729 = vmatprep.subr.bf16.mxu0 %v3313_v37  ;;  %v3367_v16 = vld [vmem:[#allocation2 + $0x444] ss:$16 sps:$4 sm:$0xff]   ;;  %v3365_v18 = vld [vmem:[#allocation2 + $0x440] ss:$16 sps:$4 sm:$0xff]   ;;  %v3392_v37 = vld [vmem:[#allocation2 + $0xc8] ss:$16 sps:$4 sm:$0xff]  }
  0x4c   :  { %v3373_v20 = vld [vmem:[#allocation2 + $0x464] ss:$16 sps:$4 sm:$0xff]   ;;  %v3371_v22 = vld [vmem:[#allocation2 + $0x460] ss:$16 sps:$4 sm:$0xff]  }
  0x4d   :  { %1687 = vmatpush1.bf16.msra.mxu1 %v3315_v38  ;;  %v3379_v24 = vld [vmem:[#allocation2 + $0x484] ss:$16 sps:$4 sm:$0xff]   ;;  %v3377_v26 = vld [vmem:[#allocation2 + $0x480] ss:$16 sps:$4 sm:$0xff]  }
  0x4e   :  { %1730 = vmatpush1.bf16.msra.mxu0 %v3316_v39  ;;  %1688 = vmatprep.subr.bf16.mxu1 %v3317_v40  ;;  %v3385_v28 = vld [vmem:[#allocation2 + $0x4a4] ss:$16 sps:$4 sm:$0xff]   ;;  %v3383_v30 = vld [vmem:[#allocation2 + $0x4a0] ss:$16 sps:$4 sm:$0xff]   ;;  %v3400_v40 = vld [vmem:[#allocation2 + $0xec] ss:$16 sps:$4 sm:$0xff]  }
  0x4f   :  { %1731 = vmatprep.subr.bf16.mxu0 %v3319_v41  ;;  %v3391_v32 = vld [vmem:[#allocation2 + $0x4c4] ss:$16 sps:$4 sm:$0xff]   ;;  %v3389_v36 = vld [vmem:[#allocation2 + $0x4c0] ss:$16 sps:$4 sm:$0xff]  }
  0x50   :  { %v3947_v34 = vld [vmem:[%s4100_s0 + $0x10] sm:$0xff] }
  0x51   :  { %1689 = vmatpush1.bf16.msra.mxu1 %v3321_v42  ;;  %v3952_v35 = vld [vmem:[%s4100_s0 + $0x30] sm:$0xff]  ;;  %v3398_v42 = vld [vmem:[#allocation2 + $0xe8] ss:$16 sps:$4 sm:$0xff]  }
  0x52   :  { %1732 = vmatpush1.bf16.msra.mxu0 %v3322_v43  ;;  %1690 = vmatprep.subr.bf16.mxu1 %v3323_v44  ;;  %v3956_v38 = vcombine.high %v3947_v34, %v3952_v35  ;;  %v3397_v39 = vld [vmem:[#allocation2 + $0x4e4] ss:$16 sps:$4 sm:$0xff]   ;;  %v3395_v41 = vld [vmem:[#allocation2 + $0x4e0] ss:$16 sps:$4 sm:$0xff]   ;;  %v3406_v44 = vld [vmem:[#allocation2 + $0x10c] ss:$16 sps:$4 sm:$0xff]  }
  0x53   :  { %1733 = vmatprep.subr.bf16.mxu0 %v3325_v45  ;;  %v3403_v43 = vld [vmem:[#allocation2 + $0x504] ss:$16 sps:$4 sm:$0xff]   ;;  %v3401_v45 = vld [vmem:[#allocation2 + $0x500] ss:$16 sps:$4 sm:$0xff]  }
  0x54   :  { %v3407_v49 = vld [vmem:[#allocation2 + $0x520] ss:$16 sps:$4 sm:$0xff]   ;;  %v3415_v51 = vld [vmem:[#allocation2 + $0x544] ss:$16 sps:$4 sm:$0xff]  }
  0x55   :  { %1691 = vmatpush1.bf16.msra.mxu1 %v3327_v46  ;;  %v3404_v46 = vld [vmem:[#allocation2 + $0x108] ss:$16 sps:$4 sm:$0xff]  }
  0x56   :  { %1734 = vmatpush1.bf16.msra.mxu0 %v3328_v47  ;;  %1692 = vmatprep.subr.bf16.mxu1 %v3329_v52  ;;  %v3409_v47 = vld [vmem:[#allocation2 + $0x524] ss:$16 sps:$4 sm:$0xff]   ;;  %v3418_v52 = vld [vmem:[#allocation2 + $0x14c] ss:$16 sps:$4 sm:$0xff]  }
  0x57   :  { %1735 = vmatprep.subr.bf16.mxu0 %v3331_v54  ;;  %v3416_v54 = vld [vmem:[#allocation2 + $0x148] ss:$16 sps:$4 sm:$0xff]  }
  0x59   :  { %1693 = vmatpush1.bf16.msra.mxu1 %v3333_v56  ;;  %v3421_v56 = vld [vmem:[#allocation2 + $0x564] ss:$16 sps:$4 sm:$0xff]  }
  0x5a   :  { %1736 = vmatpush1.bf16.msra.mxu0 %v3334_v57  ;;  %1694 = vmatprep.subr.bf16.mxu1 %v3335_v58  ;;  %v3424_v57 = vld [vmem:[#allocation2 + $0x16c] ss:$16 sps:$4 sm:$0xff]   ;;  %v3419_v58 = vld [vmem:[#allocation2 + $0x560] ss:$16 sps:$4 sm:$0xff]  }
  0x5b   :  { %1737 = vmatprep.subr.bf16.mxu0 %v3337_v59  ;;  %v3422_v59 = vld [vmem:[#allocation2 + $0x168] ss:$16 sps:$4 sm:$0xff]  }
  0x5d   :  { %1695 = vmatpush1.bf16.msra.mxu1 %v3339_v60  ;;  %v3427_v60 = vld [vmem:[#allocation2 + $0x584] ss:$16 sps:$4 sm:$0xff]  }
  0x5e   :  { %1738 = vmatpush1.bf16.msra.mxu0 %v3340_v61  ;;  %1696 = vmatprep.subr.bf16.mxu1 %v3341_v62  ;;  %v3430_v61 = vld [vmem:[#allocation2 + $0x18c] ss:$16 sps:$4 sm:$0xff]   ;;  %v3425_v62 = vld [vmem:[#allocation2 + $0x580] ss:$16 sps:$4 sm:$0xff]  }
  0x5f   :  { %1739 = vmatprep.subr.bf16.mxu0 %v3343_v63  ;;  %v3428_v63 = vld [vmem:[#allocation2 + $0x188] ss:$16 sps:$4 sm:$0xff]  }
  0x61   :  { %1697 = vmatpush1.bf16.msra.mxu1 %v3345_v0  ;;  %v3433_v0 = vld [vmem:[#allocation2 + $0x5a4] ss:$16 sps:$4 sm:$0xff]  }
  0x62   :  { %1740 = vmatpush1.bf16.msra.mxu0 %v3346_v1  ;;  %1698 = vmatprep.subr.bf16.mxu1 %v3347_v2  ;;  %v3436_v1 = vld [vmem:[#allocation2 + $0x1ac] ss:$16 sps:$4 sm:$0xff]   ;;  %v3431_v2 = vld [vmem:[#allocation2 + $0x5a0] ss:$16 sps:$4 sm:$0xff]  }
  0x63   :  { %1741 = vmatprep.subr.bf16.mxu0 %v3349_v3  ;;  %v3434_v3 = vld [vmem:[#allocation2 + $0x1a8] ss:$16 sps:$4 sm:$0xff]  }
  0x65   :  { %1699 = vmatpush1.bf16.msra.mxu1 %v3351_v4  ;;  %v3439_v4 = vld [vmem:[#allocation2 + $0x5c4] ss:$16 sps:$4 sm:$0xff]  }
  0x66   :  { %1742 = vmatpush1.bf16.msra.mxu0 %v3352_v5  ;;  %1840 = vmatprep.subr.bf16.mxu1 %v3358_v7  ;;  %v3442_v5 = vld [vmem:[#allocation2 + $0x1cc] ss:$16 sps:$4 sm:$0xff]   ;;  %v3440_v7 = vld [vmem:[#allocation2 + $0x1c8] ss:$16 sps:$4 sm:$0xff]  }
  0x67   :  { %1754 = vmatprep.subr.bf16.mxu0 %v3355_v6  ;;  %v3437_v6 = vld [vmem:[#allocation2 + $0x5c0] ss:$16 sps:$4 sm:$0xff]  }
  0x68   :  { %1701 = vmatmul.mubr.bf16.vlgmr.msra.gmra.mrb[0].mxu1 %v3938_v8 }
  0x69   :  { %1744 = vmatmul.mubr.bf16.vlgmr.msra.gmra.mrb[0].mxu0 %v3940_v9  ;;  %1841 = vmatpush1.bf16.msra.mxu1 %v3356_v11  ;;  %v3448_v11 = vld [vmem:[#allocation2 + $0x1ec] ss:$16 sps:$4 sm:$0xff]  }
  0x6a   :  { %1755 = vmatpush1.bf16.msra.mxu0 %v3353_v10  ;;  %1842 = vmatprep.subr.bf16.mxu1 %v3364_v13  ;;  %v3445_v10 = vld [vmem:[#allocation2 + $0x5e4] ss:$16 sps:$4 sm:$0xff]   ;;  %v3446_v13 = vld [vmem:[#allocation2 + $0x1e8] ss:$16 sps:$4 sm:$0xff]  }
  0x6b   :  { %1756 = vmatprep.subr.bf16.mxu0 %v3361_v12  ;;  %1872 = vmatprep.mubr.bf16.mxu1 %v2819_v53  ;;  %v3413_v53 = vld [vmem:[#allocation2 + $0x540] ss:$16 sps:$4 sm:$0xff]  }
  0x6c   :  { %1786 = vmatprep.mubr.bf16.mxu0 %v3956_v38  ;;  %v3443_v12 = vld [vmem:[#allocation2 + $0x5e0] ss:$16 sps:$4 sm:$0xff]  }
  0x6d   :  { %1843 = vmatpush1.bf16.msra.mxu1 %v3362_v15  ;;  %v3454_v15 = vld [vmem:[#allocation2 + $0x20c] ss:$16 sps:$4 sm:$0xff]  }
  0x6e   :  { %1757 = vmatpush1.bf16.msra.mxu0 %v3359_v14  ;;  %1844 = vmatprep.subr.bf16.mxu1 %v3370_v17  ;;  %v3451_v14 = vld [vmem:[#allocation2 + $0x604] ss:$16 sps:$4 sm:$0xff]   ;;  %v3449_v17 = vld [vmem:[#allocation2 + $0x600] ss:$16 sps:$4 sm:$0xff]  }
  0x6f   :  { %1758 = vmatprep.subr.bf16.mxu0 %v3367_v16  ;;  %v3961_v16 = vcombine.low %v3947_v34, %v3952_v35  ;;  %v3478_v34 = vld [vmem:[#allocation2 + $0x28c] ss:$16 sps:$4 sm:$0xff]   ;;  %v3473_v35 = vld [vmem:[#allocation2 + $0x680] ss:$16 sps:$4 sm:$0xff]  }
  0x71   :  { %1845 = vmatpush1.bf16.msra.mxu1 %v3368_v19  ;;  %v3457_v19 = vld [vmem:[#allocation2 + $0x624] ss:$16 sps:$4 sm:$0xff]  }
  0x72   :  { %1759 = vmatpush1.bf16.msra.mxu0 %v3365_v18  ;;  %1846 = vmatprep.subr.bf16.mxu1 %v3376_v21  ;;  %v3452_v18 = vld [vmem:[#allocation2 + $0x208] ss:$16 sps:$4 sm:$0xff]  }
  0x73   :  { %1760 = vmatprep.subr.bf16.mxu0 %v3373_v20  ;;  %v3460_v20 = vld [vmem:[#allocation2 + $0x22c] ss:$16 sps:$4 sm:$0xff]  }
  0x74   :  { %v3966_v21 = vld [vmem:[%s4100_s0 + $0x18] sm:$0xff] }
  0x75   :  { %1847 = vmatpush1.bf16.msra.mxu1 %v3374_v23  ;;  %v3455_v23 = vld [vmem:[#allocation2 + $0x620] ss:$16 sps:$4 sm:$0xff]  }
  0x76   :  { %1761 = vmatpush1.bf16.msra.mxu0 %v3371_v22  ;;  %1848 = vmatprep.subr.bf16.mxu1 %v3382_v25  ;;  %v3971_v22 = vld [vmem:[%s4100_s0 + $0x38] sm:$0xff] }
  0x77   :  { %1762 = vmatprep.subr.bf16.mxu0 %v3379_v24  ;;  %v3458_v24 = vld [vmem:[#allocation2 + $0x228] ss:$16 sps:$4 sm:$0xff]   ;;  %v3977_v25 = vcombine.high %v3966_v21, %v3971_v22 }
  0x79   :  { %1849 = vmatpush1.bf16.msra.mxu1 %v3380_v27  ;;  %v3466_v27 = vld [vmem:[#allocation2 + $0x24c] ss:$16 sps:$4 sm:$0xff]  }
  0x7a   :  { %1763 = vmatpush1.bf16.msra.mxu0 %v3377_v26  ;;  %1850 = vmatprep.subr.bf16.mxu1 %v3388_v29  ;;  %v3463_v26 = vld [vmem:[#allocation2 + $0x644] ss:$16 sps:$4 sm:$0xff]   ;;  %v3464_v29 = vld [vmem:[#allocation2 + $0x248] ss:$16 sps:$4 sm:$0xff]  }
  0x7b   :  { %1764 = vmatprep.subr.bf16.mxu0 %v3385_v28  ;;  %v3461_v28 = vld [vmem:[#allocation2 + $0x640] ss:$16 sps:$4 sm:$0xff]  }
  0x7d   :  { %1851 = vmatpush1.bf16.msra.mxu1 %v3386_v31  ;;  %v3467_v31 = vld [vmem:[#allocation2 + $0x660] ss:$16 sps:$4 sm:$0xff]  }
  0x7e   :  { %1765 = vmatpush1.bf16.msra.mxu0 %v3383_v30  ;;  %1852 = vmatprep.subr.bf16.mxu1 %v3394_v33  ;;  %v3472_v30 = vld [vmem:[#allocation2 + $0x26c] ss:$16 sps:$4 sm:$0xff]   ;;  %v3475_v33 = vld [vmem:[#allocation2 + $0x684] ss:$16 sps:$4 sm:$0xff]  }
  0x7f   :  { %1766 = vmatprep.subr.bf16.mxu0 %v3391_v32  ;;  %v3470_v32 = vld [vmem:[#allocation2 + $0x268] ss:$16 sps:$4 sm:$0xff]  }
  0x81   :  { %1853 = vmatpush1.bf16.msra.mxu1 %v3392_v37  ;;  %v3484_v37 = vld [vmem:[#allocation2 + $0x2ac] ss:$16 sps:$4 sm:$0xff]  }
  0x82   :  { %1767 = vmatpush1.bf16.msra.mxu0 %v3389_v36  ;;  %1854 = vmatprep.subr.bf16.mxu1 %v3400_v40  ;;  %v3476_v36 = vld [vmem:[#allocation2 + $0x288] ss:$16 sps:$4 sm:$0xff]  }
  0x83   :  { %1768 = vmatprep.subr.bf16.mxu0 %v3397_v39  ;;  %v3479_v39 = vld [vmem:[#allocation2 + $0x6a0] ss:$16 sps:$4 sm:$0xff]   ;;  %v3482_v40 = vld [vmem:[#allocation2 + $0x2a8] ss:$16 sps:$4 sm:$0xff]  }
  0x85   :  { %1855 = vmatpush1.bf16.msra.mxu1 %v3398_v42  ;;  %v3490_v42 = vld [vmem:[#allocation2 + $0x2cc] ss:$16 sps:$4 sm:$0xff]  }
  0x86   :  { %1769 = vmatpush1.bf16.msra.mxu0 %v3395_v41  ;;  %1856 = vmatprep.subr.bf16.mxu1 %v3406_v44  ;;  %v3487_v41 = vld [vmem:[#allocation2 + $0x6c4] ss:$16 sps:$4 sm:$0xff]   ;;  %v3488_v44 = vld [vmem:[#allocation2 + $0x2c8] ss:$16 sps:$4 sm:$0xff]  }
  0x87   :  { %1770 = vmatprep.subr.bf16.mxu0 %v3403_v43  ;;  %v3485_v43 = vld [vmem:[#allocation2 + $0x6c0] ss:$16 sps:$4 sm:$0xff]  }
  0x89   :  { %1857 = vmatpush1.bf16.msra.mxu1 %v3404_v46  ;;  %v3496_v46 = vld [vmem:[#allocation2 + $0x2ec] ss:$16 sps:$4 sm:$0xff]  }
  0x8a   :  { %1771 = vmatpush1.bf16.msra.mxu0 %v3401_v45  ;;  %1858 = vmatprep.subr.bf16.mxu1 %v3412_v48  ;;  %v3493_v45 = vld [vmem:[#allocation2 + $0x6e4] ss:$16 sps:$4 sm:$0xff]   ;;  %v3494_v48 = vld [vmem:[#allocation2 + $0x2e8] ss:$16 sps:$4 sm:$0xff]  }
  0x8b   :  { %1772 = vmatprep.subr.bf16.mxu0 %v3409_v47  ;;  %v3491_v47 = vld [vmem:[#allocation2 + $0x6e0] ss:$16 sps:$4 sm:$0xff]  }
  0x8d   :  { %1859 = vmatpush1.bf16.msra.mxu1 %v3410_v50  ;;  %v3502_v50 = vld [vmem:[#allocation2 + $0x30c] ss:$16 sps:$4 sm:$0xff]  }
  0x8e   :  { %1773 = vmatpush1.bf16.msra.mxu0 %v3407_v49  ;;  %1860 = vmatprep.subr.bf16.mxu1 %v3418_v52  ;;  %v3499_v49 = vld [vmem:[#allocation2 + $0x704] ss:$16 sps:$4 sm:$0xff]   ;;  %v3500_v52 = vld [vmem:[#allocation2 + $0x308] ss:$16 sps:$4 sm:$0xff]  }
  0x8f   :  { %1774 = vmatprep.subr.bf16.mxu0 %v3415_v51  ;;  %v3497_v51 = vld [vmem:[#allocation2 + $0x700] ss:$16 sps:$4 sm:$0xff]  }
  0x91   :  { %1861 = vmatpush1.bf16.msra.mxu1 %v3416_v54  ;;  %v3508_v54 = vld [vmem:[#allocation2 + $0x32c] ss:$16 sps:$4 sm:$0xff]  }
  0x92   :  { %1775 = vmatpush1.bf16.msra.mxu0 %v3413_v53  ;;  %1862 = vmatprep.subr.bf16.mxu1 %v3424_v57  ;;  %v3505_v53 = vld [vmem:[#allocation2 + $0x724] ss:$16 sps:$4 sm:$0xff]   ;;  %v3506_v57 = vld [vmem:[#allocation2 + $0x328] ss:$16 sps:$4 sm:$0xff]  }
  0x93   :  { %1776 = vmatprep.subr.bf16.mxu0 %v3421_v56  ;;  %v3503_v56 = vld [vmem:[#allocation2 + $0x720] ss:$16 sps:$4 sm:$0xff]  }
  0x95   :  { %1863 = vmatpush1.bf16.msra.mxu1 %v3422_v59  ;;  %v3514_v59 = vld [vmem:[#allocation2 + $0x34c] ss:$16 sps:$4 sm:$0xff]  }
  0x96   :  { %1777 = vmatpush1.bf16.msra.mxu0 %v3419_v58  ;;  %1864 = vmatprep.subr.bf16.mxu1 %v3430_v61  ;;  %v3511_v58 = vld [vmem:[#allocation2 + $0x744] ss:$16 sps:$4 sm:$0xff]   ;;  %v3512_v61 = vld [vmem:[#allocation2 + $0x348] ss:$16 sps:$4 sm:$0xff]  }
  0x97   :  { %1778 = vmatprep.subr.bf16.mxu0 %v3427_v60  ;;  %v3509_v60 = vld [vmem:[#allocation2 + $0x740] ss:$16 sps:$4 sm:$0xff]  }
  0x99   :  { %1865 = vmatpush1.bf16.msra.mxu1 %v3428_v63  ;;  %v3520_v63 = vld [vmem:[#allocation2 + $0x36c] ss:$16 sps:$4 sm:$0xff]  }
  0x9a   :  { %1779 = vmatpush1.bf16.msra.mxu0 %v3425_v62  ;;  %1866 = vmatprep.subr.bf16.mxu1 %v3436_v1  ;;  %v3517_v62 = vld [vmem:[#allocation2 + $0x764] ss:$16 sps:$4 sm:$0xff]   ;;  %v3518_v1 = vld [vmem:[#allocation2 + $0x368] ss:$16 sps:$4 sm:$0xff]  }
  0x9b   :  { %1780 = vmatprep.subr.bf16.mxu0 %v3433_v0  ;;  %v3515_v0 = vld [vmem:[#allocation2 + $0x760] ss:$16 sps:$4 sm:$0xff]  }
  0x9d   :  { %1867 = vmatpush1.bf16.msra.mxu1 %v3434_v3  ;;  %v3526_v3 = vld [vmem:[#allocation2 + $0x38c] ss:$16 sps:$4 sm:$0xff]  }
  0x9e   :  { %1781 = vmatpush1.bf16.msra.mxu0 %v3431_v2  ;;  %1868 = vmatprep.subr.bf16.mxu1 %v3442_v5  ;;  %v3523_v2 = vld [vmem:[#allocation2 + $0x784] ss:$16 sps:$4 sm:$0xff]   ;;  %v3524_v5 = vld [vmem:[#allocation2 + $0x388] ss:$16 sps:$4 sm:$0xff]  }
  0x9f   :  { %1782 = vmatprep.subr.bf16.mxu0 %v3439_v4  ;;  %v3521_v4 = vld [vmem:[#allocation2 + $0x780] ss:$16 sps:$4 sm:$0xff]  }
  0xa1   :  { %1869 = vmatpush1.bf16.msra.mxu1 %v3440_v7  ;;  %v3532_v7 = vld [vmem:[#allocation2 + $0x3ac] ss:$16 sps:$4 sm:$0xff]  }
  0xa2   :  { %1783 = vmatpush1.bf16.msra.mxu0 %v3437_v6  ;;  %1870 = vmatprep.subr.bf16.mxu1 %v3448_v11  ;;  %v3529_v6 = vld [vmem:[#allocation2 + $0x7a4] ss:$16 sps:$4 sm:$0xff]   ;;  %v3530_v11 = vld [vmem:[#allocation2 + $0x3a8] ss:$16 sps:$4 sm:$0xff]  }
  0xa3   :  { %1784 = vmatprep.subr.bf16.mxu0 %v3445_v10  ;;  %v3527_v10 = vld [vmem:[#allocation2 + $0x7a0] ss:$16 sps:$4 sm:$0xff]  }
  0xa5   :  { %1871 = vmatpush1.bf16.msra.mxu1 %v3446_v13  ;;  %v3538_v13 = vld [vmem:[#allocation2 + $0x3cc] ss:$16 sps:$4 sm:$0xff]  }
  0xa6   :  { %1785 = vmatpush1.bf16.msra.mxu0 %v3443_v12  ;;  %1883 = vmatprep.subr.bf16.mxu1 %v3454_v15  ;;  %v3535_v12 = vld [vmem:[#allocation2 + $0x7c4] ss:$16 sps:$4 sm:$0xff]   ;;  %v3536_v15 = vld [vmem:[#allocation2 + $0x3c8] ss:$16 sps:$4 sm:$0xff]  }
  0xa7   :  { %1797 = vmatprep.subr.bf16.mxu0 %v3451_v14  ;;  %v3533_v14 = vld [vmem:[#allocation2 + $0x7c0] ss:$16 sps:$4 sm:$0xff]  }
  0xa8   :  { %1873 = vmatmul.mubr.bf16.vlgmr.msra.gmra.mrb[4].mxu1 %v3938_v8  ;;  %v3469_v8 = vld [vmem:[#allocation2 + $0x664] ss:$16 sps:$4 sm:$0xff]  }
  0xa9   :  { %1787 = vmatmul.mubr.bf16.vlgmr.msra.gmra.mrb[0].mxu0 %v3961_v16  ;;  %1884 = vmatpush1.bf16.msra.mxu1 %v3452_v18  ;;  %v3544_v18 = vld [vmem:[#allocation2 + $0x3ec] ss:$16 sps:$4 sm:$0xff]  }
  0xaa   :  { %1798 = vmatpush1.bf16.msra.mxu0 %v3449_v17  ;;  %1885 = vmatprep.subr.bf16.mxu1 %v3460_v20  ;;  %v3541_v17 = vld [vmem:[#allocation2 + $0x7e4] ss:$16 sps:$4 sm:$0xff]   ;;  %v3542_v20 = vld [vmem:[#allocation2 + $0x3e8] ss:$16 sps:$4 sm:$0xff]  }
  0xab   :  { %1799 = vmatprep.subr.bf16.mxu0 %v3457_v19  ;;  %1829 = vmatprep.mubr.bf16.mxu0 %v3977_v25  ;;  %v3539_v19 = vld [vmem:[#allocation2 + $0x7e0] ss:$16 sps:$4 sm:$0xff]  }
  0xac   :  { %1915 = vmatprep.mubr.bf16.mxu1 %v3935_v55  ;;  %v3481_v55 = vld [vmem:[#allocation2 + $0x6a4] ss:$16 sps:$4 sm:$0xff]  }
  0xad   :  { %1886 = vmatpush1.bf16.msra.mxu1 %v3458_v24  ;;  %v3545_v24 = vld [vmem:[#allocation2 + $0x408] ss:$16 sps:$4 sm:$0xff]  }
  0xae   :  { %1800 = vmatpush1.bf16.msra.mxu0 %v3455_v23  ;;  %1887 = vmatprep.subr.bf16.mxu1 %v3466_v27  ;;  %v3547_v23 = vld [vmem:[#allocation2 + $0x40c] ss:$16 sps:$4 sm:$0xff]  }
  0xaf   :  { %1801 = vmatprep.subr.bf16.mxu0 %v3463_v26  ;;  %v3983_v26 = vcombine.low %v3966_v21, %v3971_v22  ;;  %v3550_v27 = vld [vmem:[#allocation2 + $0x42c] ss:$16 sps:$4 sm:$0xff]   ;;  %v3644_v21 = vld [vmem:[#allocation5 + $0x10] ss:$8 sps:$4 sm:$0xff]  }
  0xb0   :  { %v3649_v22 = vld [vmem:[#allocation5 + $0x24] ss:$8 sps:$4 sm:$0xff]  }
  0xb1   :  { %1888 = vmatpush1.bf16.msra.mxu1 %v3464_v29  ;;  %v3643_v29 = vld [vmem:[#allocation5 + $0x4] ss:$8 sps:$4 sm:$0xff]  }
  0xb2   :  { %1802 = vmatpush1.bf16.msra.mxu0 %v3461_v28  ;;  %1889 = vmatprep.subr.bf16.mxu1 %v3472_v30  ;;  %v3641_v28 = vld [vmem:[#allocation5] ss:$8 sps:$4 sm:$0xff]   ;;  %v3646_v30 = vld [vmem:[#allocation5 + $0x14] ss:$8 sps:$4 sm:$0xff]  }
  0xb3   :  { %1803 = vmatprep.subr.bf16.mxu0 %v3469_v8  ;;  %v3548_v8 = vld [vmem:[#allocation2 + $0x428] ss:$16 sps:$4 sm:$0xff]  }
  0xb5   :  { %1890 = vmatpush1.bf16.msra.mxu1 %v3470_v32  ;;  %v3551_v32 = vld [vmem:[#allocation2 + $0x448] ss:$16 sps:$4 sm:$0xff]  }
  0xb6   :  { %1804 = vmatpush1.bf16.msra.mxu0 %v3467_v31  ;;  %1891 = vmatprep.subr.bf16.mxu1 %v3478_v34  ;;  %v3553_v31 = vld [vmem:[#allocation2 + $0x44c] ss:$16 sps:$4 sm:$0xff]   ;;  %v3554_v34 = vld [vmem:[#allocation2 + $0x468] ss:$16 sps:$4 sm:$0xff]  }
  0xb7   :  { %1805 = vmatprep.subr.bf16.mxu0 %v3475_v33  ;;  %v3556_v33 = vld [vmem:[#allocation2 + $0x46c] ss:$16 sps:$4 sm:$0xff]  }
  0xb9   :  { %1892 = vmatpush1.bf16.msra.mxu1 %v3476_v36  ;;  %v3652_v36 = vld [vmem:[#allocation5 + $0x34] ss:$8 sps:$4 sm:$0xff]  }
  0xba   :  { %1806 = vmatpush1.bf16.msra.mxu0 %v3473_v35  ;;  %1893 = vmatprep.subr.bf16.mxu1 %v3484_v37  ;;  %v3559_v35 = vld [vmem:[#allocation2 + $0x48c] ss:$16 sps:$4 sm:$0xff]   ;;  %v3557_v37 = vld [vmem:[#allocation2 + $0x488] ss:$16 sps:$4 sm:$0xff]  }
  0xbb   :  { %1807 = vmatprep.subr.bf16.mxu0 %v3481_v55  ;;  %v3655_v55 = vld [vmem:[#allocation5 + $0x44] ss:$8 sps:$4 sm:$0xff]  }
  0xbd   :  { %1894 = vmatpush1.bf16.msra.mxu1 %v3482_v40  ;;  %v3653_v40 = vld [vmem:[#allocation5 + $0x40] ss:$8 sps:$4 sm:$0xff]  }
  0xbe   :  { %1808 = vmatpush1.bf16.msra.mxu0 %v3479_v39  ;;  %1895 = vmatprep.subr.bf16.mxu1 %v3490_v42  ;;  %v3562_v39 = vld [vmem:[#allocation2 + $0x4ac] ss:$16 sps:$4 sm:$0xff]   ;;  %v3560_v42 = vld [vmem:[#allocation2 + $0x4a8] ss:$16 sps:$4 sm:$0xff]  }
  0xbf   :  { %1809 = vmatprep.subr.bf16.mxu0 %v3487_v41  ;;  %v3658_v41 = vld [vmem:[#allocation5 + $0x54] ss:$8 sps:$4 sm:$0xff]  }
  0xc1   :  { %1896 = vmatpush1.bf16.msra.mxu1 %v3488_v44  ;;  %v3656_v44 = vld [vmem:[#allocation5 + $0x50] ss:$8 sps:$4 sm:$0xff]  }
  0xc2   :  { %1810 = vmatpush1.bf16.msra.mxu0 %v3485_v43  ;;  %1897 = vmatprep.subr.bf16.mxu1 %v3496_v46  ;;  %v3565_v43 = vld [vmem:[#allocation2 + $0x4cc] ss:$16 sps:$4 sm:$0xff]   ;;  %v3563_v46 = vld [vmem:[#allocation2 + $0x4c8] ss:$16 sps:$4 sm:$0xff]  }
  0xc3   :  { %1811 = vmatprep.subr.bf16.mxu0 %v3493_v45  ;;  %v3661_v45 = vld [vmem:[#allocation5 + $0x64] ss:$8 sps:$4 sm:$0xff]  }
  0xc5   :  { %1898 = vmatpush1.bf16.msra.mxu1 %v3494_v48  ;;  %v3659_v48 = vld [vmem:[#allocation5 + $0x60] ss:$8 sps:$4 sm:$0xff]  }
  0xc6   :  { %1812 = vmatpush1.bf16.msra.mxu0 %v3491_v47  ;;  %1899 = vmatprep.subr.bf16.mxu1 %v3502_v50  ;;  %v3568_v47 = vld [vmem:[#allocation2 + $0x4ec] ss:$16 sps:$4 sm:$0xff]   ;;  %v3566_v50 = vld [vmem:[#allocation2 + $0x4e8] ss:$16 sps:$4 sm:$0xff]  }
  0xc7   :  { %1813 = vmatprep.subr.bf16.mxu0 %v3499_v49  ;;  %v3664_v49 = vld [vmem:[#allocation5 + $0x74] ss:$8 sps:$4 sm:$0xff]  }
  0xc9   :  { %1900 = vmatpush1.bf16.msra.mxu1 %v3500_v52  ;;  %v3662_v52 = vld [vmem:[#allocation5 + $0x70] ss:$8 sps:$4 sm:$0xff]  }
  0xca   :  { %1814 = vmatpush1.bf16.msra.mxu0 %v3497_v51  ;;  %1901 = vmatprep.subr.bf16.mxu1 %v3508_v54  ;;  %v3571_v51 = vld [vmem:[#allocation2 + $0x50c] ss:$16 sps:$4 sm:$0xff]   ;;  %v3569_v54 = vld [vmem:[#allocation2 + $0x508] ss:$16 sps:$4 sm:$0xff]  }
  0xcb   :  { %1815 = vmatprep.subr.bf16.mxu0 %v3505_v53  ;;  %v3667_v53 = vld [vmem:[#allocation5 + $0x84] ss:$8 sps:$4 sm:$0xff]  }
  0xcd   :  { %1902 = vmatpush1.bf16.msra.mxu1 %v3506_v57  ;;  %v3665_v57 = vld [vmem:[#allocation5 + $0x80] ss:$8 sps:$4 sm:$0xff]  }
  0xce   :  { %1816 = vmatpush1.bf16.msra.mxu0 %v3503_v56  ;;  %1903 = vmatprep.subr.bf16.mxu1 %v3514_v59  ;;  %v3574_v56 = vld [vmem:[#allocation2 + $0x52c] ss:$16 sps:$4 sm:$0xff]   ;;  %v3572_v59 = vld [vmem:[#allocation2 + $0x528] ss:$16 sps:$4 sm:$0xff]  }
  0xcf   :  { %1817 = vmatprep.subr.bf16.mxu0 %v3511_v58  ;;  %v3670_v58 = vld [vmem:[#allocation5 + $0x94] ss:$8 sps:$4 sm:$0xff]  }
  0xd1   :  { %1904 = vmatpush1.bf16.msra.mxu1 %v3512_v61  ;;  %v3668_v61 = vld [vmem:[#allocation5 + $0x90] ss:$8 sps:$4 sm:$0xff]  }
  0xd2   :  { %1818 = vmatpush1.bf16.msra.mxu0 %v3509_v60  ;;  %1905 = vmatprep.subr.bf16.mxu1 %v3520_v63  ;;  %v3577_v60 = vld [vmem:[#allocation2 + $0x54c] ss:$16 sps:$4 sm:$0xff]   ;;  %v3575_v63 = vld [vmem:[#allocation2 + $0x548] ss:$16 sps:$4 sm:$0xff]  }
  0xd3   :  { %1819 = vmatprep.subr.bf16.mxu0 %v3517_v62  ;;  %v3673_v62 = vld [vmem:[#allocation5 + $0xa4] ss:$8 sps:$4 sm:$0xff]  }
  0xd5   :  { %1906 = vmatpush1.bf16.msra.mxu1 %v3518_v1  ;;  %v3671_v1 = vld [vmem:[#allocation5 + $0xa0] ss:$8 sps:$4 sm:$0xff]  }
  0xd6   :  { %1820 = vmatpush1.bf16.msra.mxu0 %v3515_v0  ;;  %1907 = vmatprep.subr.bf16.mxu1 %v3526_v3  ;;  %v3580_v0 = vld [vmem:[#allocation2 + $0x56c] ss:$16 sps:$4 sm:$0xff]   ;;  %v3578_v3 = vld [vmem:[#allocation2 + $0x568] ss:$16 sps:$4 sm:$0xff]  }
  0xd7   :  { %1821 = vmatprep.subr.bf16.mxu0 %v3523_v2  ;;  %v3676_v2 = vld [vmem:[#allocation5 + $0xb4] ss:$8 sps:$4 sm:$0xff]  }
  0xd9   :  { %1908 = vmatpush1.bf16.msra.mxu1 %v3524_v5  ;;  %v3674_v5 = vld [vmem:[#allocation5 + $0xb0] ss:$8 sps:$4 sm:$0xff]  }
  0xda   :  { %1822 = vmatpush1.bf16.msra.mxu0 %v3521_v4  ;;  %1909 = vmatprep.subr.bf16.mxu1 %v3532_v7  ;;  %v3583_v4 = vld [vmem:[#allocation2 + $0x58c] ss:$16 sps:$4 sm:$0xff]   ;;  %v3581_v7 = vld [vmem:[#allocation2 + $0x588] ss:$16 sps:$4 sm:$0xff]  }
  0xdb   :  { %1823 = vmatprep.subr.bf16.mxu0 %v3529_v6  ;;  %v3679_v6 = vld [vmem:[#allocation5 + $0xc4] ss:$8 sps:$4 sm:$0xff]  }
  0xdd   :  { %1910 = vmatpush1.bf16.msra.mxu1 %v3530_v11  ;;  %v3677_v11 = vld [vmem:[#allocation5 + $0xc0] ss:$8 sps:$4 sm:$0xff]  }
  0xde   :  { %1824 = vmatpush1.bf16.msra.mxu0 %v3527_v10  ;;  %1911 = vmatprep.subr.bf16.mxu1 %v3538_v13  ;;  %v3586_v10 = vld [vmem:[#allocation2 + $0x5ac] ss:$16 sps:$4 sm:$0xff]   ;;  %v3584_v13 = vld [vmem:[#allocation2 + $0x5a8] ss:$16 sps:$4 sm:$0xff]  }
  0xdf   :  { %1825 = vmatprep.subr.bf16.mxu0 %v3535_v12  ;;  %v3682_v12 = vld [vmem:[#allocation5 + $0xd4] ss:$8 sps:$4 sm:$0xff]  }
  0xe1   :  { %1912 = vmatpush1.bf16.msra.mxu1 %v3536_v15  ;;  %v3680_v15 = vld [vmem:[#allocation5 + $0xd0] ss:$8 sps:$4 sm:$0xff]  }
  0xe2   :  { %1826 = vmatpush1.bf16.msra.mxu0 %v3533_v14  ;;  %1913 = vmatprep.subr.bf16.mxu1 %v3544_v18  ;;  %v3589_v14 = vld [vmem:[#allocation2 + $0x5cc] ss:$16 sps:$4 sm:$0xff]  }
  0xe3   :  { %1827 = vmatprep.subr.bf16.mxu0 %v3541_v17  ;;  %v3587_v17 = vld [vmem:[#allocation2 + $0x5c8] ss:$16 sps:$4 sm:$0xff]   ;;  %v3592_v18 = vld [vmem:[#allocation2 + $0x5ec] ss:$16 sps:$4 sm:$0xff]  }
  0xe5   :  { %1914 = vmatpush1.bf16.msra.mxu1 %v3542_v20  ;;  %v3595_v20 = vld [vmem:[#allocation2 + $0x60c] ss:$16 sps:$4 sm:$0xff]  }
  0xe6   :  { %1828 = vmatpush1.bf16.msra.mxu0 %v3539_v19  ;;  %1926 = vmatprep.subr.bf16.mxu1 %v3547_v23  ;;  %v3590_v19 = vld [vmem:[#allocation2 + $0x5e8] ss:$16 sps:$4 sm:$0xff]  }
  0xe7   :  { %2420 = vmatprep.subr.bf16.mxu0 %v3643_v29  ;;  %v3593_v23 = vld [vmem:[#allocation2 + $0x608] ss:$16 sps:$4 sm:$0xff]  }
  0xe8   :  { %1916 = vmatmul.mubr.bf16.vlgmr.msra.gmra.mrb[4].mxu1 %v3940_v9  ;;  %v3647_v9 = vld [vmem:[#allocation5 + $0x20] ss:$8 sps:$4 sm:$0xff]  }
  0xe9   :  { %1830 = vmatmul.mubr.bf16.vlgmr.msra.gmra.mrb[0].mxu0 %v3983_v26  ;;  %1927 = vmatpush1.bf16.msra.mxu1 %v3545_v24  ;;  %v3598_v24 = vld [vmem:[#allocation2 + $0x62c] ss:$16 sps:$4 sm:$0xff]   ;;  %v3599_v29 = vld [vmem:[#allocation2 + $0x648] ss:$16 sps:$4 sm:$0xff]  }
  0xea   :  { %1958 = vmatprep.mubr.bf16.mxu1 %v3956_v38  ;;  %1928 = vmatprep.subr.bf16.mxu1 %v3550_v27  ;;  %v3650_v38 = vld [vmem:[#allocation5 + $0x30] ss:$8 sps:$4 sm:$0xff]  }
  0xeb   :  { %2421 = vmatpush1.bf16.msra.mxu0 %v3641_v28  ;;  %v3596_v27 = vld [vmem:[#allocation2 + $0x628] ss:$16 sps:$4 sm:$0xff]   ;;  %v3601_v28 = vld [vmem:[#allocation2 + $0x64c] ss:$16 sps:$4 sm:$0xff]  }
  0xec   :  { %2422 = vmatprep.subr.bf16.mxu0 %v3646_v30  ;;  %v3602_v30 = vld [vmem:[#allocation2 + $0x668] ss:$16 sps:$4 sm:$0xff]  }
  0xed   :  { %1929 = vmatpush1.bf16.msra.mxu1 %v3548_v8  ;;  %v3604_v8 = vld [vmem:[#allocation2 + $0x66c] ss:$16 sps:$4 sm:$0xff]  }
  0xee   :  { %1930 = vmatprep.subr.bf16.mxu1 %v3553_v31  ;;  %v3607_v31 = vld [vmem:[#allocation2 + $0x68c] ss:$16 sps:$4 sm:$0xff]  }
  0xef   :  { %2423 = vmatpush1.bf16.msra.mxu0 %v3644_v21  ;;  %v3605_v21 = vld [vmem:[#allocation2 + $0x688] ss:$16 sps:$4 sm:$0xff]  }
  0xf0   :  { %2424 = vmatprep.subr.bf16.mxu0 %v3649_v22  ;;  %v3610_v22 = vld [vmem:[#allocation2 + $0x6ac] ss:$16 sps:$4 sm:$0xff]  }
  0xf1   :  { %1931 = vmatpush1.bf16.msra.mxu1 %v3551_v32  ;;  %v3613_v32 = vld [vmem:[#allocation2 + $0x6cc] ss:$16 sps:$4 sm:$0xff]  }
  0xf2   :  { %1932 = vmatprep.subr.bf16.mxu1 %v3556_v33 }
  0xf3   :  { %2425 = vmatpush1.bf16.msra.mxu0 %v3647_v9  ;;  %v3685_v9 = vld [vmem:[#allocation5 + $0xe4] ss:$8 sps:$4 sm:$0xff]  }
  0xf4   :  { %2426 = vmatprep.subr.bf16.mxu0 %v3652_v36  ;;  %v3683_v36 = vld [vmem:[#allocation5 + $0xe0] ss:$8 sps:$4 sm:$0xff]  }
  0xf5   :  { %1933 = vmatpush1.bf16.msra.mxu1 %v3554_v34 }
  0xf6   :  { %1934 = vmatprep.subr.bf16.mxu1 %v3559_v35  ;;  %v3611_v35 = vld [vmem:[#allocation2 + $0x6c8] ss:$16 sps:$4 sm:$0xff]  }
  0xf7   :  { %2427 = vmatpush1.bf16.msra.mxu0 %v3650_v38 }
  0xf8   :  { %2428 = vmatprep.subr.bf16.mxu0 %v3655_v55  ;;  %v3616_v55 = vld [vmem:[#allocation2 + $0x6ec] ss:$16 sps:$4 sm:$0xff]  }
  0xf9   :  { %1935 = vmatpush1.bf16.msra.mxu1 %v3557_v37  ;;  %v3688_v37 = vld [vmem:[#allocation5 + $0xf4] ss:$8 sps:$4 sm:$0xff]  }
  0xfa   :  { %1936 = vmatprep.subr.bf16.mxu1 %v3562_v39  ;;  %v3614_v39 = vld [vmem:[#allocation2 + $0x6e8] ss:$16 sps:$4 sm:$0xff]  }
  0xfb   :  { %2429 = vmatpush1.bf16.msra.mxu0 %v3653_v40  ;;  %v3686_v40 = vld [vmem:[#allocation5 + $0xf0] ss:$8 sps:$4 sm:$0xff]  }
  0xfc   :  { %2430 = vmatprep.subr.bf16.mxu0 %v3658_v41  ;;  %v3619_v41 = vld [vmem:[#allocation2 + $0x70c] ss:$16 sps:$4 sm:$0xff]  }
  0xfd   :  { %1937 = vmatpush1.bf16.msra.mxu1 %v3560_v42  ;;  %v3617_v42 = vld [vmem:[#allocation2 + $0x708] ss:$16 sps:$4 sm:$0xff]  }
  0xfe   :  { %1938 = vmatprep.subr.bf16.mxu1 %v3565_v43  ;;  %v3622_v43 = vld [vmem:[#allocation2 + $0x72c] ss:$16 sps:$4 sm:$0xff]  }
  0xff   :  { %2431 = vmatpush1.bf16.msra.mxu0 %v3656_v44  ;;  %v3691_v44 = vld [vmem:[#allocation5 + $0x104] ss:$8 sps:$4 sm:$0xff]  }
 0x100   :  { %2432 = vmatprep.subr.bf16.mxu0 %v3661_v45  ;;  %v3620_v45 = vld [vmem:[#allocation2 + $0x728] ss:$16 sps:$4 sm:$0xff]  }
 0x101   :  { %1939 = vmatpush1.bf16.msra.mxu1 %v3563_v46  ;;  %v3625_v46 = vld [vmem:[#allocation2 + $0x74c] ss:$16 sps:$4 sm:$0xff]  }
 0x102   :  { %1940 = vmatprep.subr.bf16.mxu1 %v3568_v47  ;;  %v3623_v47 = vld [vmem:[#allocation2 + $0x748] ss:$16 sps:$4 sm:$0xff]  }
 0x103   :  { %2433 = vmatpush1.bf16.msra.mxu0 %v3659_v48  ;;  %v3628_v48 = vld [vmem:[#allocation2 + $0x76c] ss:$16 sps:$4 sm:$0xff]  }
 0x104   :  { %2434 = vmatprep.subr.bf16.mxu0 %v3664_v49  ;;  %v3626_v49 = vld [vmem:[#allocation2 + $0x768] ss:$16 sps:$4 sm:$0xff]  }
 0x105   :  { %1941 = vmatpush1.bf16.msra.mxu1 %v3566_v50  ;;  %v3631_v50 = vld [vmem:[#allocation2 + $0x78c] ss:$16 sps:$4 sm:$0xff]  }
 0x106   :  { %1942 = vmatprep.subr.bf16.mxu1 %v3571_v51  ;;  %v3629_v51 = vld [vmem:[#allocation2 + $0x788] ss:$16 sps:$4 sm:$0xff]  }
 0x107   :  { %2435 = vmatpush1.bf16.msra.mxu0 %v3662_v52  ;;  %v3634_v52 = vld [vmem:[#allocation2 + $0x7ac] ss:$16 sps:$4 sm:$0xff]  }
 0x108   :  { %2436 = vmatprep.subr.bf16.mxu0 %v3667_v53  ;;  %v3632_v53 = vld [vmem:[#allocation2 + $0x7a8] ss:$16 sps:$4 sm:$0xff]  }
 0x109   :  { %1943 = vmatpush1.bf16.msra.mxu1 %v3569_v54  ;;  %v3637_v54 = vld [vmem:[#allocation2 + $0x7cc] ss:$16 sps:$4 sm:$0xff]  }
 0x10a   :  { %1944 = vmatprep.subr.bf16.mxu1 %v3574_v56  ;;  %v3635_v56 = vld [vmem:[#allocation2 + $0x7c8] ss:$16 sps:$4 sm:$0xff]  }
 0x10b   :  { %2437 = vmatpush1.bf16.msra.mxu0 %v3665_v57  ;;  %v3640_v57 = vld [vmem:[#allocation2 + $0x7ec] ss:$16 sps:$4 sm:$0xff]  }
 0x10c   :  { %2438 = vmatprep.subr.bf16.mxu0 %v3670_v58  ;;  %v3638_v58 = vld [vmem:[#allocation2 + $0x7e8] ss:$16 sps:$4 sm:$0xff]  }
 0x10d   :  { %1945 = vmatpush1.bf16.msra.mxu1 %v3572_v59  ;;  %v328_v59 = vlaneseq }
 0x10e   :  { %1946 = vmatprep.subr.bf16.mxu1 %v3577_v60 }
 0x10f   :  { %2439 = vmatpush1.bf16.msra.mxu0 %v3668_v61  ;;  %v3992_v60 = vshrl.u32 %v328_v59, 7 }
 0x110   :  { %2440 = vmatprep.subr.bf16.mxu0 %v3673_v62  ;;  %v3998_v62 = vld [vmem:[%s4102_s2] sm:$0xf] }
 0x111   :  { %1947 = vmatpush1.bf16.msra.mxu1 %v3575_v63  ;;  %v330_v61 = vsub.s32 0, %v3992_v60  ;;  %v334_v63 = vsub.s32 1, %v3992_v60 }
 0x112   :  { %1948 = vmatprep.subr.bf16.mxu1 %v3580_v0 }
 0x113   :  { %2441 = vmatpush1.bf16.msra.mxu0 %v3671_v1  ;;  %v331_v0 = vrot.slane %v3998_v62, %v330_v61 }
 0x114   :  { %2442 = vmatprep.subr.bf16.mxu0 %v3676_v2 }
 0x115   :  { %1949 = vmatpush1.bf16.msra.mxu1 %v3578_v3 }
 0x116   :  { %1950 = vmatprep.subr.bf16.mxu1 %v3583_v4 }
 0x117   :  { %2443 = vmatpush1.bf16.msra.mxu0 %v3674_v5 }
 0x118   :  { %2444 = vmatprep.subr.bf16.mxu0 %v3679_v6 }
 0x119   :  { %1951 = vmatpush1.bf16.msra.mxu1 %v3581_v7 }
 0x11a   :  { %1952 = vmatprep.subr.bf16.mxu1 %v3586_v10 }
 0x11b   :  { %2445 = vmatpush1.bf16.msra.mxu0 %v3677_v11 }
 0x11c   :  { %2446 = vmatprep.subr.bf16.mxu0 %v3682_v12 }
 0x11d   :  { %1953 = vmatpush1.bf16.msra.mxu1 %v3584_v13 }
 0x11e   :  { %1954 = vmatprep.subr.bf16.mxu1 %v3589_v14 }
 0x11f   :  { %2447 = vmatpush1.bf16.msra.mxu0 %v3680_v15 }
 0x120   :  { %2448 = vmatprep.subr.bf16.mxu0 %v3685_v9  ;;  %v3712_v9 = vld [vmem:[#allocation5 + $0x174] ss:$8 sps:$4 sm:$0xff]  }
 0x121   :  { %1955 = vmatpush1.bf16.msra.mxu1 %v3587_v17 }
 0x122   :  { %1956 = vmatprep.subr.bf16.mxu1 %v3592_v18 }
 0x123   :  { %2449 = vmatpush1.bf16.msra.mxu0 %v3683_v36  ;;  %v3713_v36 = vld [vmem:[#allocation5 + $0x180] ss:$8 sps:$4 sm:$0xff]  }
 0x124   :  { %2450 = vmatprep.subr.bf16.mxu0 %v3688_v37  ;;  %v3721_v37 = vld [vmem:[#allocation5 + $0x1a4] ss:$8 sps:$4 sm:$0xff]  }
 0x125   :  { %1957 = vmatpush1.bf16.msra.mxu1 %v3590_v19 }
 0x126   :  { %1969 = vmatprep.subr.bf16.mxu1 %v3595_v20 }
 0x127   :  { %2451 = vmatpush1.bf16.msra.mxu0 %v3686_v40  ;;  %v3724_v40 = vld [vmem:[#allocation5 + $0x1b4] ss:$8 sps:$4 sm:$0xff]  }
 0x128   :  { %1959 = vmatmul.mubr.bf16.vlgmr.msra.gmra.mrb[4].mxu1 %v3961_v16  ;;  %v3608_v16 = vld [vmem:[#allocation2 + $0x6a8] ss:$16 sps:$4 sm:$0xff]   ;;  %2463 = vmatprep.subr.bf16.mxu0 %v3691_v44  ;;  %v3730_v44 = vld [vmem:[#allocation5 + $0x1d4] ss:$8 sps:$4 sm:$0xff]  }
 0x129   :  { %1970 = vmatpush1.bf16.msra.mxu1 %v3593_v23  ;;  %2001 = vmatprep.mubr.bf16.mxu1 %v3977_v25 }
 0x12a   :  { %1971 = vmatprep.subr.bf16.mxu1 %v3598_v24  ;;  %v3689_v24 = vld [vmem:[#allocation5 + $0x100] ss:$8 sps:$4 sm:$0xff]  }
 0x12d   :  { %1972 = vmatpush1.bf16.msra.mxu1 %v3596_v27  ;;  %v3694_v27 = vld [vmem:[#allocation5 + $0x114] ss:$8 sps:$4 sm:$0xff]  }
 0x12e   :  { %1973 = vmatprep.subr.bf16.mxu1 %v3601_v28  ;;  %v3692_v28 = vld [vmem:[#allocation5 + $0x110] ss:$8 sps:$4 sm:$0xff]  }
 0x131   :  { %1974 = vmatpush1.bf16.msra.mxu1 %v3599_v29  ;;  %v3697_v29 = vld [vmem:[#allocation5 + $0x124] ss:$8 sps:$4 sm:$0xff]  }
 0x132   :  { %1975 = vmatprep.subr.bf16.mxu1 %v3604_v8  ;;  %v3695_v8 = vld [vmem:[#allocation5 + $0x120] ss:$8 sps:$4 sm:$0xff]  }
 0x135   :  { %1976 = vmatpush1.bf16.msra.mxu1 %v3602_v30  ;;  %v3700_v30 = vld [vmem:[#allocation5 + $0x134] ss:$8 sps:$4 sm:$0xff]  }
 0x136   :  { %1977 = vmatprep.subr.bf16.mxu1 %v3607_v31  ;;  %v3698_v31 = vld [vmem:[#allocation5 + $0x130] ss:$8 sps:$4 sm:$0xff]  }
 0x139   :  { %1978 = vmatpush1.bf16.msra.mxu1 %v3605_v21  ;;  %v3703_v21 = vld [vmem:[#allocation5 + $0x144] ss:$8 sps:$4 sm:$0xff]  }
 0x13a   :  { %1979 = vmatprep.subr.bf16.mxu1 %v3610_v22  ;;  %v3701_v22 = vld [vmem:[#allocation5 + $0x140] ss:$8 sps:$4 sm:$0xff]  }
 0x13b   :  { %v1702_v33 = vpop.f32.mrb[0].mxu1 }
 0x13c   :  { %v1704_v25 = vpop.f32.mrb[1].mxu1  ;;  %v1703_v1 = vadd.f32 %v1702_v33, %v331_v0  ;;  %v3709_v33 = vld [vmem:[#allocation5 + $0x164] ss:$8 sps:$4 sm:$0xff]  }
 0x13d   :  { %v1706_v34 = vpop.f32.mrb[2].mxu1  ;;  %1980 = vmatpush1.bf16.msra.mxu1 %v3608_v16  ;;  %v3706_v16 = vld [vmem:[#allocation5 + $0x154] ss:$8 sps:$4 sm:$0xff]  }
 0x13e   :  { %v1708_v38 = vpop.f32.mrb[3].mxu1  ;;  %1981 = vmatprep.subr.bf16.mxu1 %v3613_v32  ;;  %v1707_v4 = vadd.f32 %v1706_v34, %v331_v0  ;;  %v3704_v32 = vld [vmem:[#allocation5 + $0x150] ss:$8 sps:$4 sm:$0xff]  }
 0x13f   :  { %v3710_v34 = vld [vmem:[#allocation5 + $0x170] ss:$8 sps:$4 sm:$0xff]  }
 0x141   :  { %1982 = vmatpush1.bf16.msra.mxu1 %v3611_v35  ;;  %v3715_v35 = vld [vmem:[#allocation5 + $0x184] ss:$8 sps:$4 sm:$0xff]  }
 0x142   :  { %1983 = vmatprep.subr.bf16.mxu1 %v3616_v55  ;;  %v3716_v55 = vld [vmem:[#allocation5 + $0x190] ss:$8 sps:$4 sm:$0xff]  }
 0x145   :  { %1984 = vmatpush1.bf16.msra.mxu1 %v3614_v39  ;;  %v3719_v39 = vld [vmem:[#allocation5 + $0x1a0] ss:$8 sps:$4 sm:$0xff]  }
 0x146   :  { %1985 = vmatprep.subr.bf16.mxu1 %v3619_v41  ;;  %v3722_v41 = vld [vmem:[#allocation5 + $0x1b0] ss:$8 sps:$4 sm:$0xff]  }
 0x149   :  { %1986 = vmatpush1.bf16.msra.mxu1 %v3617_v42  ;;  %v3727_v42 = vld [vmem:[#allocation5 + $0x1c4] ss:$8 sps:$4 sm:$0xff]  }
 0x14a   :  { %1987 = vmatprep.subr.bf16.mxu1 %v3622_v43  ;;  %v3725_v43 = vld [vmem:[#allocation5 + $0x1c0] ss:$8 sps:$4 sm:$0xff]  }
 0x14d   :  { %1988 = vmatpush1.bf16.msra.mxu1 %v3620_v45  ;;  %v3728_v45 = vld [vmem:[#allocation5 + $0x1d0] ss:$8 sps:$4 sm:$0xff]  }
 0x14e   :  { %1989 = vmatprep.subr.bf16.mxu1 %v3625_v46  ;;  %v3733_v46 = vld [vmem:[#allocation5 + $0x1e4] ss:$8 sps:$4 sm:$0xff]  }
 0x151   :  { %1990 = vmatpush1.bf16.msra.mxu1 %v3623_v47  ;;  %v3731_v47 = vld [vmem:[#allocation5 + $0x1e0] ss:$8 sps:$4 sm:$0xff]  }
 0x152   :  { %1991 = vmatprep.subr.bf16.mxu1 %v3628_v48  ;;  %v3736_v48 = vld [vmem:[#allocation5 + $0x1f4] ss:$8 sps:$4 sm:$0xff]  }
 0x155   :  { %1992 = vmatpush1.bf16.msra.mxu1 %v3626_v49  ;;  %v3734_v49 = vld [vmem:[#allocation5 + $0x1f0] ss:$8 sps:$4 sm:$0xff]  }
 0x156   :  { %1993 = vmatprep.subr.bf16.mxu1 %v3631_v50  ;;  %v3737_v50 = vld [vmem:[%s4105_s5 + $0x40] sm:$0xff]  }
 0x159   :  { %1994 = vmatpush1.bf16.msra.mxu1 %v3629_v51  ;;  %v338_v51 = vsub.s32 2, %v3992_v60 }
 0x15a   :  { %1995 = vmatprep.subr.bf16.mxu1 %v3634_v52  ;;  %v342_v52 = vsub.s32 3, %v3992_v60  ;;  %v3754_v60 = vld [vmem:[%s4107_s7 + $0x8] sm:$0xff]  }
 0x15d   :  { %1996 = vmatpush1.bf16.msra.mxu1 %v3632_v53  ;;  %v339_v53 = vrot.slane %v3998_v62, %v338_v51 }
 0x15e   :  { %1997 = vmatprep.subr.bf16.mxu1 %v3637_v54  ;;  %v343_v54 = vrot.slane %v3998_v62, %v342_v52 }
 0x161   :  { %1998 = vmatpush1.bf16.msra.mxu1 %v3635_v56 }
 0x162   :  { %1999 = vmatprep.subr.bf16.mxu1 %v3640_v57 }
 0x165   :  { %2000 = vmatpush1.bf16.msra.mxu1 %v3638_v58 }
 0x168   :  { %2002 = vmatmul.mubr.bf16.vlgmr.msra.gmra.mrb[4].mxu1 %v3983_v26  ;;  %v335_v26 = vrot.slane %v3998_v62, %v334_v63  ;;  %v3739_v62 = vld [vmem:[%s4105_s5 + $0x48] sm:$0xff]  }
 0x16a   :  { %v1705_v2 = vadd.f32 %v1704_v25, %v335_v26  ;;  %v1709_v7 = vadd.f32 %v1708_v38, %v335_v26  ;;  %v3707_v25 = vld [vmem:[#allocation5 + $0x160] ss:$8 sps:$4 sm:$0xff]   ;;  %v3718_v38 = vld [vmem:[#allocation5 + $0x194] ss:$8 sps:$4 sm:$0xff]  }
 0x1bc   :  { %v1831_v3 = vpop.f32.mrb[0].mxu0 }
 0x1bd   :  { %v3209_v5 = vadd.f32 %v1831_v3, %v1703_v1  ;;  %v1833_v6 = vpop.f32.mrb[1].mxu0 }
 0x1be   :  { %v3211_v10 = vadd.f32 %v1833_v6, %v1705_v2  ;;  %v1835_v11 = vpop.f32.mrb[2].mxu0 }
 0x1bf   :  { %v3213_v12 = vadd.f32 %v1835_v11, %v1707_v4  ;;  %v1837_v13 = vpop.f32.mrb[3].mxu0  ;;  %v2012_v15 = vmax.f32 %v3209_v5, 0.0 }
 0x1c0   :  { %v3215_v14 = vadd.f32 %v1837_v13, %v1709_v7  ;;  %v2013_v18 = vmax.f32 %v3211_v10, 0.0  ;;  %v3740_v13 = vld [vmem:[%s4105_s5 + $0x8] sm:$0xff]  }
 0x1c1   :  { %v2016_v17 = vmax.f32 %v3213_v12, 0.0  ;;  %v3738_v12 = vld [vmem:[%s4105_s5] sm:$0xff]  }
 0x1c2   :  { %v2017_v19 = vmax.f32 %v3215_v14, 0.0  ;;  %v3741_v14 = vld [vmem:[%s4105_s5 + $0x50] sm:$0xff]  }
 0x1c3   :  { %v2020_v20 = vpack.c.bf16 %v2016_v17, %v2012_v15  ;;  %v3742_v15 = vld [vmem:[%s4105_s5 + $0x10] sm:$0xff]   ;;  %v3743_v17 = vld [vmem:[%s4105_s5 + $0x58] sm:$0xff]  }
 0x1c4   :  { %v2021_v23 = vpack.c.bf16 %v2017_v19, %v2013_v18  ;;  %v3744_v18 = vld [vmem:[%s4105_s5 + $0x18] sm:$0xff]   ;;  %v3745_v19 = vld [vmem:[%s4105_s5 + $0x60] sm:$0xff]  }
 0x1c6   :  { %2452 = vmatprep.mubr.bf16.mxu0 %v2021_v23  ;;  %v3747_v23 = vld [vmem:[%s4105_s5 + $0x68] sm:$0xff]  }
 0x1c7   :  { %2453 = vmatmul.mubr.bf16.vlgmr.msra.gmra.mrb[4].mxu0 %v2020_v20  ;;  %v3746_v20 = vld [vmem:[%s4105_s5 + $0x20] sm:$0xff]  }
 0x1c8   :  { %2464 = vmatpush1.bf16.msra.mxu0 %v3689_v24  ;;  %v3748_v24 = vld [vmem:[%s4105_s5 + $0x28] sm:$0xff]  }
 0x1c9   :  { %2465 = vmatprep.subr.bf16.mxu0 %v3694_v27  ;;  %v3749_v27 = vld [vmem:[%s4105_s5 + $0x70] sm:$0xff]  }
 0x1cc   :  { %2466 = vmatpush1.bf16.msra.mxu0 %v3692_v28  ;;  %v3750_v28 = vld [vmem:[%s4105_s5 + $0x30] sm:$0xff]  }
 0x1cd   :  { %2467 = vmatprep.subr.bf16.mxu0 %v3697_v29  ;;  %v3751_v29 = vld [vmem:[%s4105_s5 + $0x78] sm:$0xff]  }
 0x1d0   :  { %2468 = vmatpush1.bf16.msra.mxu0 %v3695_v8  ;;  %v3752_v8 = vld [vmem:[%s4105_s5 + $0x38] sm:$0xff]  }
 0x1d1   :  { %2469 = vmatprep.subr.bf16.mxu0 %v3700_v30  ;;  %v3753_v30 = vld [vmem:[%s4107_s7] sm:$0xff]  }
 0x1d4   :  { %2470 = vmatpush1.bf16.msra.mxu0 %v3698_v31  ;;  %v3843_v31 = vmov 0.0  }
 0x1d5   :  { %2471 = vmatprep.subr.bf16.mxu0 %v3703_v21  ;;  %3196 = vmatprep.subr.bf16.mxu1 %v3843_v31  ;;  %v2088_v21 = vld [vmem:[%s4104_s4] sm:$0x3] }
 0x1d6   :  { %3197 = vmatpush3.bf16.msra.mxu1 %v3753_v30  ;;  %3204 = vmatprep.mubr.msk.bf16.mxu1 %vm3844_vm0, %v3843_v31 }
 0x1d7   :  { %3198 = vmatprep.subr.bf16.mxu1 %v3843_v31 }
 0x1d8   :  { %2472 = vmatpush1.bf16.msra.mxu0 %v3701_v22  ;;  %v2093_v22 = vrot.slane %v2088_v21, %v330_v61  ;;  %v3755_v61 = vld [vmem:[%s4107_s7 + $0x10] sm:$0xff]  }
 0x1d9   :  { %2473 = vmatprep.subr.bf16.mxu0 %v3706_v16  ;;  %v2097_v16 = vrot.slane %v2088_v21, %v334_v63  ;;  %v3756_v63 = vld [vmem:[%s4107_s7 + $0x18] sm:$0xff]  }
 0x1da   :  { %3199 = vmatpush3.bf16.msra.mxu1 %v3754_v60 }
 0x1db   :  { %3200 = vmatprep.subr.bf16.mxu1 %v3843_v31 }
 0x1dc   :  { %2474 = vmatpush1.bf16.msra.mxu0 %v3704_v32 }
 0x1dd   :  { %2475 = vmatprep.subr.bf16.mxu0 %v3709_v33 }
 0x1de   :  { %3201 = vmatpush3.bf16.msra.mxu1 %v3755_v61 }
 0x1df   :  { %3202 = vmatprep.subr.bf16.mxu1 %v3843_v31 }
 0x1e0   :  { %2476 = vmatpush1.bf16.msra.mxu0 %v3707_v25 }
 0x1e1   :  { %2477 = vmatprep.subr.bf16.mxu0 %v3712_v9 }
 0x1e2   :  { %3203 = vmatpush3.bf16.msra.mxu1 %v3756_v63 }
 0x1e4   :  { %2478 = vmatpush1.bf16.msra.mxu0 %v3710_v34 }
 0x1e5   :  { %2479 = vmatprep.subr.bf16.mxu0 %v3715_v35 }
 0x1e8   :  { %2480 = vmatpush1.bf16.msra.mxu0 %v3713_v36 }
 0x1e9   :  { %2481 = vmatprep.subr.bf16.mxu0 %v3718_v38 }
 0x1ec   :  { %2482 = vmatpush1.bf16.msra.mxu0 %v3716_v55 }
 0x1ed   :  { %2483 = vmatprep.subr.bf16.mxu0 %v3721_v37 }
 0x1f0   :  { %2484 = vmatpush1.bf16.msra.mxu0 %v3719_v39 }
 0x1f1   :  { %2485 = vmatprep.subr.bf16.mxu0 %v3724_v40 }
 0x1f4   :  { %2486 = vmatpush1.bf16.msra.mxu0 %v3722_v41 }
 0x1f5   :  { %2487 = vmatprep.subr.bf16.mxu0 %v3727_v42 }
 0x1f8   :  { %2488 = vmatpush1.bf16.msra.mxu0 %v3725_v43 }
 0x1f9   :  { %2489 = vmatprep.subr.bf16.mxu0 %v3730_v44  ;;  %v3146_v44 = vld [vmem:[%s4106_s6] ss:$0 sm:$0xff]  ;;  %s3845_s6 = smov [#allocation7]  }
 0x1fc   :  { %2490 = vmatpush1.bf16.msra.mxu0 %v3728_v45 }
 0x1fd   :  { %2491 = vmatprep.subr.bf16.mxu0 %v3733_v46 }
 0x200   :  { %2492 = vmatpush1.bf16.msra.mxu0 %v3731_v47 }
 0x201   :  { %2493 = vmatprep.subr.bf16.mxu0 %v3736_v48 }
 0x204   :  { %2494 = vmatpush1.bf16.msra.mxu0 %v3734_v49 }
 0x205   :  { %3169 = vmatprep.subr.bf16.mxu0 %v3737_v50 }
 0x23b   :  { %v2003_v56 = vpop.f32.mrb[4].mxu1 }
 0x23c   :  { %v3216_v57 = vadd.f32 %v2003_v56, %v339_v53  ;;  %v2005_v58 = vpop.f32.mrb[5].mxu1  ;;  %v2776_v56 = vand.u32 127, %v328_v59 }
 0x23d   :  { %v3217_v0 = vadd.f32 %v2005_v58, %v343_v54  ;;  %v2007_v26 = vpop.f32.mrb[6].mxu1 }
 0x23e   :  { %v3218_v1 = vadd.f32 %v2007_v26, %v339_v53  ;;  %v2009_v2 = vpop.f32.mrb[7].mxu1  ;;  %v2014_v4 = vmax.f32 %v3216_v57, 0.0  ;;  %v3163_v57 = vld [vmem:[%s4108_s8] ss:$0 sm:$0xff]  ;;  %vm2777_vm2 = vcmp.lt.s32.totalorder %v2776_v56, 10  ;;  %s2805_s8 = sshll.u32 %s3845_s6, 4  ;;  %s2806_s8 = int_to_ptr.vmem [resolvable:$true] %s2805_s8 }
 0x23f   :  { %v3219_v3 = vadd.f32 %v2009_v2, %v343_v54  ;;  %v2015_v6 = vmax.f32 %v3217_v0, 0.0  ;;  %s3809_s29 = scalar_lea.vmem %s2806_s8, 256  ;;  %p3814_p3 = scmp.lt.s32.totalorder %s2806_s8, %s2806_s8 }
 0x240   :  { %v2018_v5 = vmax.f32 %v3218_v1, 0.0  ;;  %p3810_p2 = scmp.ne.s32.totalorder %s2806_s8, %s3809_s29  ;;  %p3815_p4 = scmp.lt.s32.totalorder %s3809_s29, %s3809_s29 }
 0x241   :  { %v2019_v7 = vmax.f32 %v3219_v3, 0.0 }
 0x242   :  { %v2022_v10 = vpack.c.bf16 %v2018_v5, %v2014_v4  ;;  %p3816_p5 = por %p3815_p4, %p3814_p3 }
 0x243   :  { %v2023_v11 = vpack.c.bf16 %v2019_v7, %v2015_v6 }
 0x244   :  { %p3817_p6 = pnand %p3816_p5, %p3810_p2 }
 0x245   :  { %2495 = vmatprep.mubr.bf16.mxu0 %v2023_v11 }
 0x246   :  { %2496 = vmatmul.mubr.bf16.vlgmr.msra.gmra.mrb[4].mxu0 %v2022_v10 }
 0x247   :  { %3170 = vmatpush3.bf16.msra.mxu0 %v3738_v12 }
 0x248   :  { %3171 = vmatprep.subr.bf16.mxu0 %v3739_v62 }
 0x24b   :  { %3172 = vmatpush3.bf16.msra.mxu0 %v3740_v13 }
 0x24c   :  { %3173 = vmatprep.subr.bf16.mxu0 %v3741_v14 }
 0x24f   :  { %3174 = vmatpush3.bf16.msra.mxu0 %v3742_v15 }
 0x250   :  { %3175 = vmatprep.subr.bf16.mxu0 %v3743_v17 }
 0x253   :  { %3176 = vmatpush3.bf16.msra.mxu0 %v3744_v18 }
 0x254   :  { %3177 = vmatprep.subr.bf16.mxu0 %v3745_v19 }
 0x257   :  { %3178 = vmatpush3.bf16.msra.mxu0 %v3746_v20 }
 0x258   :  { %3179 = vmatprep.subr.bf16.mxu0 %v3747_v23 }
 0x25b   :  { %3180 = vmatpush3.bf16.msra.mxu0 %v3748_v24 }
 0x25c   :  { %3181 = vmatprep.subr.bf16.mxu0 %v3749_v27 }
 0x25f   :  { %3182 = vmatpush3.bf16.msra.mxu0 %v3750_v28 }
 0x260   :  { %3183 = vmatprep.subr.bf16.mxu0 %v3751_v29 }
 0x263   :  { %3184 = vmatpush3.bf16.msra.mxu0 %v3752_v8 }
 0x319   :  { %v2497_v32 = vpop.f32.mrb[4].mxu0 }
 0x31a   :  { %v3220_v33 = vadd.f32 %v2497_v32, %v2093_v22  ;;  %v2499_v25 = vpop.f32.mrb[5].mxu0 }
 0x31b   :  { %v3221_v9 = vadd.f32 %v2499_v25, %v2097_v16  ;;  %v2501_v34 = vpop.f32.mrb[6].mxu0 }
 0x31c   :  { %v3222_v35 = vadd.f32 %v2501_v34, %v2093_v22  ;;  %v2503_v36 = vpop.f32.mrb[7].mxu0  ;;  %v2506_v55 = vmax.f32 %v3220_v33, 0.0 }
 0x31d   :  { %v3223_v38 = vadd.f32 %v2503_v36, %v2097_v16  ;;  %v2507_v39 = vmax.f32 %v3221_v9, 0.0 }
 0x31e   :  { %v2508_v37 = vmax.f32 %v3222_v35, 0.0 }
 0x31f   :  { %v2509_v40 = vmax.f32 %v3223_v38, 0.0 }
 0x320   :  { %v2510_v41 = vpack.c.bf16 %v2508_v37, %v2506_v55 }
 0x321   :  { %v2511_v42 = vpack.c.bf16 %v2509_v40, %v2507_v39 }
 0x323   :  { %2679 = vmatprep.mubr.bf16.mxu0 %v2511_v42 }
 0x324   :  { %2680 = vmatmul.mubr.bf16.vlgmr.msra.gmra.mrb[8].mxu0 %v2510_v41 }
 0x3f7   :  { %v3185_v43 = vpop.f32.mrb[8].mxu0 }
 0x3f8   :  { %v3186_v45 = vpop.f32.mrb[9].mxu0 }
 0x3f9   :  { %v3187_v46 = vadd.f32 %v3186_v45, %v3185_v43  ;;  %v3188_v47 = vpop.f32.mrb[10].mxu0 }
 0x3fa   :  { %v3189_v48 = vpop.f32.mrb[11].mxu0 }
 0x3fb   :  { %v2682_v49 = vadd.f32 %v3187_v46, %v3146_v44  ;;  %v3190_v50 = vadd.f32 %v3189_v48, %v3188_v47 }
 0x3fd   :  { %v2685_v51 = vadd.f32 %v3190_v50, %v3146_v44  ;;  %v2688_v52 = vmax.f32 %v2682_v49, 0.0 }
 0x3ff   :  { %v2689_v53 = vmax.f32 %v2685_v51, 0.0 }
 0x401   :  { %v2690_v54 = vpack.c.bf16 %v2689_v53, %v2688_v52 }
 0x403   :  { %3205 = vmatmul.mubr.msk.bf16.vlgmr.msra.gmra.mrb[8].mxu1 %vm2730_vm1, %v2690_v54 }
 0x4d6   :  { %v2768_v58 = vpop.f32.mrb[8].mxu1 }
 0x4d7   :  { %v2769_v0 = vadd.f32 %v3163_v57, %v2768_v58  ;;  %v3206_v26 = vpop.f32.mrb[9].mxu1 }
 0x4d8   :  { %v2771_v1 = vpop.f32.mrb[10].mxu1 }
 0x4d9   :  { %v2772_v2 = vadd.f32 %v3163_v57, %v2771_v1  ;;  %v3207_v3 = vpop.f32.mrb[11].mxu1  ;;  %v2778_v4 = vsel %vm2777_vm2, %v2769_v0, -1e+30 }
 0x4da   :  { %2780 = vmax.xlane.f32.xlu0 %v2778_v4 }
 0x4db   :  { %v2779_v5 = vsel %vm2777_vm2, %v2772_v2, -1e+30 }
 0x4de   :  { %2782 = vmax.xlane.f32.xlu0 %v2779_v5 }
 0x567   :  { %v2781_v6 = vpop.xlane.xlu0 %2780 }
 0x568   :  { %v2784_v7 = vsub.f32 %v2778_v4, %v2781_v6 }
 0x56a   :  { %v2786_v10 = vmul.f32 1.442695, %v2784_v7 }
 0x56b   :  { %v2783_v11 = vpop.xlane.xlu0 %2782 }
 0x56c   :  { %3757 = vpow2.f32 %v2786_v10  ;;  %v2785_v59 = vsub.f32 %v2779_v5, %v2783_v11 }
 0x56e   :  { %v2788_v12 = vmul.f32 1.442695, %v2785_v59 }
 0x570   :  { %3759 = vpow2.f32 %v2788_v12 }
 0x576   :  { %v3758_v62 = vpop.eup %3757 }
 0x577   :  { %2790 = vadd.xlane.f32.xlu1 %v3758_v62 }
 0x57a   :  { %v3760_v13 = vpop.eup %3759 }
 0x57b   :  { %2792 = vadd.xlane.f32.xlu1 %v3760_v13 }
 0x604   :  { %v2791_v14 = vpop.xlane.xlu1 %2790 }
 0x605   :  { %3761 = vrcp.f32 %v2791_v14 }
 0x608   :  { %v2793_v15 = vpop.xlane.xlu1 %2792 }
 0x609   :  { %3763 = vrcp.f32 %v2793_v15 }
 0x60f   :  { %v3762_v17 = vpop.eup %3761 }
 0x610   :  { %v2795_v18 = vmul.f32 %v3762_v17, %v3758_v62 }
 0x612   :  { %2798 = vst [vmem:[#allocation7] sm:$0xff] %v2795_v18 }
 0x613   :  { %v3764_v19 = vpop.eup %3763 }
 0x614   :  { %v2797_v20 = vmul.f32 %v3764_v19, %v3760_v13 }
 0x616   :  { %2799 = vst [vmem:[#allocation7 + $0x8] sm:$0xff] %v2797_v20 }
 0x617   :  { %3820 = shalt.err (!%p3817_p6)
}
 0x618   :  { %s3821_s2 = scalar_lea.hbm %s4109_s9, 256 }
 0x619   :  { %p3822_p7 = scmp.ne.s32.totalorder %s4109_s9, %s3821_s2  ;;  %p3825_p8 = scmp.lt.u32.totalorder %s3821_s2, %s4109_s9 }
 0x61b   :  { %p3827_p9 = pnand %p3825_p8, %p3822_p7 }
 0x61d   :  { %3830 = shalt.err (!%p3827_p9)
}
 0x61e   :  { %2811 = dma.vmem_to_hbm [thread:$0]  %s2806_s8, 256, %s4109_s9, [#allocation4], %s3841_s1, %s3841_s1, %s3842_s10  }
 0x61f   :  { %3835 = dma.done.wait [#allocation4], 256  }
 0x620   :  { %3836 = vsyncadd [#allocation4], 4294967040 }
 0x621   :  { %2815 = vsyncpa [#allocation3], 1 }
 0x622   :  { %2816 = vsyncpa [#allocation6], 1 }
 0x623   :  { %2817 = vsyncpa [#allocation4], 1 }

</bundles_post_ra>
